<compile_context>
chip_gen: v6e
topology: v6e:2x2x1
jax: 0.10.0
libtpu: 0.0.40
codegen_flags: <defaults>
</compile_context>

<pallas_src>
import functools

import jax
import jax.numpy as jnp
from jax import lax
from jax.experimental import pallas as pl
from jax.experimental.pallas import tpu as pltpu


def _gelu_tanh(x):
    # TODO(synk): PyTorch nn.GELU() default is the exact erf form; the tanh
    # approximation is used for guaranteed TPU/EUP lowering (~1e-3 abs).
    c = jnp.float32(0.7978845608028654)  # sqrt(2/pi)
    return 0.5 * x * (1.0 + jnp.tanh(c * (x + 0.044715 * x * x * x)))


def _fold_attention_scale(w_qkv, b_qkv, reduced_channels, scale):
    """Fold the 1/sqrt(head_dim*n_views) score scale into the q rows."""
    s = jnp.float32(scale)
    wq = jnp.concatenate([w_qkv[:reduced_channels] * s,
                          w_qkv[reduced_channels:]], axis=0)
    bq = jnp.concatenate([b_qkv[:reduced_channels] * s,
                          b_qkv[reduced_channels:]], axis=0)
    return wq, bq


# -----------------------------------------------------------------------------
# Fused kernel.  One grid step = `batch_block` batch elements.
#   x_ref    : (C, N)  f32, N = batch_block * n_views * pix  (lane axis)
#   weights  : PyTorch (Cout, Cin) orientation (pre-cast to compute dtype),
#              biases / BN as (Cout, 1) f32 columns
#   qkv_scr  : (3*CR, batch_block*n_views, pix)  attention-major re-layout
#   att_scr  : (CR, N)                            conv-major attended values
# -----------------------------------------------------------------------------
def _fused_cross_view_kernel(x_ref, wqkv_ref, bqkv_ref, wproj_ref, bproj_ref,
                             w1_ref, b1_ref, w2_ref, b2_ref, bns_ref, bnt_ref,
                             o_ref, qkv_scr, att_scr, *,
                             batch_block, n_views, num_heads, head_dim, pix,
                             compute_dtype):
    cdt = compute_dtype
    cr = num_heads * head_dim

    x_f32 = x_ref[...]                                   # (C, N) f32
    x_c = x_f32.astype(cdt)

    # ---- qkv 1x1 conv: ONE lane-dense matmul over the whole slab -----------
    qkv = (jnp.dot(wqkv_ref[...], x_c, preferred_element_type=jnp.float32)
           + bqkv_ref[...]).astype(cdt)                  # (3CR, N)

    # ---- re-layout qkv to (3CR, BV, P) via per-view lane slices -------------
    # (one pass; no lane-splitting value reshapes -> always lowers)
    for j in range(batch_block * n_views):
        qkv_scr[:, j, :] = qkv[:, j * pix:(j + 1) * pix]

    # ---- cross-view attention: one batched dot per head for scores & mixing -
    for bb in range(batch_block):
        s0 = bb * n_views
        for h in range(num_heads):
            r0 = h * head_dim
            qh = qkv_scr[r0:r0 + head_dim, s0:s0 + n_views, :]            # (hd,V,P)
            kh = qkv_scr[cr + r0:cr + r0 + head_dim, s0:s0 + n_views, :]  # (hd,V,P)
            vh = qkv_scr[2 * cr + r0:2 * cr + r0 + head_dim,
                         s0:s0 + n_views, :]                              # (hd,V,P)

            # scores: batch over hd, contract the pixel (lane) axis
            sd = lax.dot_general(qh, kh, (((2,), (2,)), ((0,), (0,))),
                                 preferred_element_type=jnp.float32)      # (hd,V,V)
            s = sd.sum(axis=0)                    # scale already folded into Wq
            s = s - jnp.max(s, axis=-1, keepdims=True)
            e = jnp.exp(s)
            a = e / jnp.sum(e, axis=-1, keepdims=True)                    # (V,V)

            # mix values across views: batch over hd ('bqk,bkd->bqd' pattern)
            ab = jnp.broadcast_to(a.astype(cdt), (head_dim, n_views, n_views))
            mixed = lax.dot_general(ab, vh, (((2,), (1,)), ((0,), (0,))),
                                    preferred_element_type=jnp.float32)   # (hd,V,P)
            mixed = mixed.astype(cdt)

            # write back conv-major (rows = reduced channel, lanes = (b,v,p))
            for v in range(n_views):
                j = s0 + v
                att_scr[r0:r0 + head_dim, j * pix:(j + 1) * pix] = mixed[:, v, :]

    att = att_scr[...]                                   # (CR, N) cdt

    # ---- proj conv + residual + FFN + folded eval BatchNorm (all lane-dense)
    y = (jnp.dot(wproj_ref[...], att, preferred_element_type=jnp.float32)
         + bproj_ref[...]) + x_f32                       # (C, N) f32
    h1 = (jnp.dot(w1_ref[...], y.astype(cdt), preferred_element_type=jnp.float32)
          + b1_ref[...])
    h1 = _gelu_tanh(h1)
    f = (jnp.dot(w2_ref[...], h1.astype(cdt), preferred_element_type=jnp.float32)
         + b2_ref[...])
    # eval-mode BatchNorm (folded scale/shift); Dropout(eval) = identity
    o_ref[...] = (f * bns_ref[...] + bnt_ref[...]).astype(o_ref.dtype)


def cross_view_attention_forward(x, params, *, num_heads,
                                 compute_dtype=jnp.bfloat16, batch_block=1):
    """x: (B, V, C, H, W) float32 -> (B, V, C, H, W)."""
    b, n_views, c, hgt, wid = x.shape
    three_cr, c_in = params["w_qkv"].shape
    assert c_in == c
    cr = three_cr // 3
    head_dim = cr // num_heads
    pix = hgt * wid
    scale = 1.0 / float((head_dim * n_views) ** 0.5)

    # batch_block handling: block lane extent must be a multiple of 128 (or the
    # full extent); fall back to processing the whole batch in one step.
    if b % batch_block != 0:
        batch_block = b
    n_block = batch_block * n_views * pix
    if n_block % 128 != 0 and n_block != b * n_views * pix:
        batch_block = b
        n_block = b * n_views * pix
    n_total = b * n_views * pix

    # Host-side layout change to channel-major (C, B*V*H*W): the lane axis is
    # (batch, view, pixel) so every conv matmul and the output store are
    # lane-dense (review item #1 / #9).  This is the only transpose in/out.
    x2 = jnp.transpose(x, (2, 0, 1, 3, 4)).reshape(c, n_total)

    # Fold the attention scale into the q rows; pre-cast conv weights to the
    # MXU compute dtype host-side (cast happens once, not per grid step).
    wq_f, bq_f = _fold_attention_scale(params["w_qkv"], params["b_qkv"],
                                       cr, scale)
    wqkv_c = wq_f.astype(compute_dtype)
    wproj_c = params["w_proj"].astype(compute_dtype)
    w1_c = params["w_ffn1"].astype(compute_dtype)
    w2_c = params["w_ffn2"].astype(compute_dtype)

    def _full(shape):
        return pl.BlockSpec(shape, lambda i: (0,) * len(shape))

    kernel = functools.partial(
        _fused_cross_view_kernel, batch_block=batch_block, n_views=n_views,
        num_heads=num_heads, head_dim=head_dim, pix=pix,
        compute_dtype=compute_dtype)

    out2 = pl.pallas_call(
        kernel,
        out_shape=jax.ShapeDtypeStruct((c, n_total), x.dtype),
        grid_spec=pltpu.PrefetchScalarGridSpec(
            num_scalar_prefetch=0,
            grid=(b // batch_block,),
            in_specs=[
                pl.BlockSpec((c, n_block), lambda i: (0, i)),   # activations
                _full((3 * cr, c)), _full((3 * cr, 1)),         # qkv_conv
                _full((c, cr)), _full((c, 1)),                  # proj_conv
                _full((c, c)), _full((c, 1)),                   # ffn conv1
                _full((c, c)), _full((c, 1)),                   # ffn conv2
                _full((c, 1)), _full((c, 1)),                   # folded BatchNorm
            ],
            out_specs=pl.BlockSpec((c, n_block), lambda i: (0, i)),
            scratch_shapes=[
                pltpu.VMEM((3 * cr, batch_block * n_views, pix), compute_dtype),
                pltpu.VMEM((cr, n_block), compute_dtype),
            ],
        ),
        compiler_params=pltpu.CompilerParams(
            dimension_semantics=("parallel",),
            # Raise for large feature maps (<=128 MiB on v5e/v6e, ~48 MiB v7x).
            vmem_limit_bytes=32 * 1024 * 1024),
    )(x2, wqkv_c, bq_f, wproj_c, params["b_proj"],
      w1_c, params["b_ffn1"], w2_c, params["b_ffn2"],
      params["bn_scale"], params["bn_shift"])

    return jnp.transpose(out2.reshape(c, b, n_views, hgt, wid),
                         (1, 2, 0, 3, 4))


# -----------------------------------------------------------------------------
# Pure-JAX reference (same math & same cast points, no Pallas) for the check.
# -----------------------------------------------------------------------------
def reference_forward(x, params, *, num_heads, compute_dtype=jnp.bfloat16):
    b, n_views, c, hgt, wid = x.shape
    cr = params["w_qkv"].shape[0] // 3
    hd = cr // num_heads
    p = hgt * wid
    scale = 1.0 / float((hd * n_views) ** 0.5)
    cdt = compute_dtype

    wq_f, bq_f = _fold_attention_scale(params["w_qkv"], params["b_qkv"],
                                       cr, scale)
    wq_c = wq_f.astype(cdt)
    wproj_c = params["w_proj"].astype(cdt)
    w1_c = params["w_ffn1"].astype(cdt)
    w2_c = params["w_ffn2"].astype(cdt)

    xf = x.reshape(b, n_views, c, p).astype(jnp.float32)

    def conv1x1(t, w, bias):          # t: (B,V,Cin,P), w: (Cout,Cin) cdt
        return jnp.einsum("oc,bvcp->bvop", w, t.astype(cdt),
                          preferred_element_type=jnp.float32) + bias

    qkv = conv1x1(xf, wq_c, bq_f).astype(cdt)
    q, k, vv = qkv[:, :, :cr], qkv[:, :, cr:2 * cr], qkv[:, :, 2 * cr:]
    qh = q.reshape(b, n_views, num_heads, hd, p)
    kh = k.reshape(b, n_views, num_heads, hd, p)
    vh = vv.reshape(b, n_views, num_heads, hd, p)
    s = jnp.einsum("bvhdp,buhdp->bhvu", qh, kh,
                   preferred_element_type=jnp.float32)
    a = jax.nn.softmax(s, axis=-1)
    att = jnp.einsum("bhvu,buhdp->bvhdp", a.astype(cdt), vh,
                     preferred_element_type=jnp.float32)
    att = att.reshape(b, n_views, cr, p).astype(cdt)
    y = conv1x1(att, wproj_c, params["b_proj"]) + xf
    g = _gelu_tanh(conv1x1(y, w1_c, params["b_ffn1"]))
    f = conv1x1(g, w2_c, params["b_ffn2"])
    out = f * params["bn_scale"] + params["bn_shift"]
    return out.reshape(b, n_views, c, hgt, wid)


if __name__ == "__main__":
    # small, shape-consistent example
    B, V, C, H, W = 2, 4, 16, 8, 8
    NUM_HEADS, REDUCTION = 2, 2
    CR = C // REDUCTION                       # reduced_channels = 8
    assert CR % NUM_HEADS == 0

    key = jax.random.PRNGKey(0)
    ks = jax.random.split(key, 9)
    f32 = jnp.float32
    params = {
        # PyTorch-native (Cout, Cin) 1x1-conv weights; biases as column vectors
        "w_qkv":  jax.random.normal(ks[0], (3 * CR, C), f32) * 0.05,
        "b_qkv":  jax.random.normal(ks[1], (3 * CR, 1), f32) * 0.01,
        "w_proj": jax.random.normal(ks[2], (C, CR), f32) * 0.05,
        "b_proj": jax.random.normal(ks[3], (C, 1), f32) * 0.01,
        "w_ffn1": jax.random.normal(ks[4], (C, C), f32) * 0.05,
        "b_ffn1": jax.random.normal(ks[5], (C, 1), f32) * 0.01,
        "w_ffn2": jax.random.normal(ks[6], (C, C), f32) * 0.05,
        "b_ffn2": jax.random.normal(ks[7], (C, 1), f32) * 0.01,
        # eval-mode BatchNorm at init stats: running_mean=0, running_var=1,
        # gamma=1, beta=0 (real checkpoints: fold running stats in here)
        "bn_scale": jnp.ones((C, 1), f32) / jnp.sqrt(jnp.float32(1.0 + 1e-5)),
        "bn_shift": jnp.zeros((C, 1), f32),
    }

    x = jax.random.normal(ks[8], (B, V, C, H, W), f32)

    out = cross_view_attention_forward(x, params, num_heads=NUM_HEADS)
    out = jax.block_until_ready(out)
    assert out.shape == (B, V, C, H, W)

    ref = reference_forward(x, params, num_heads=NUM_HEADS)
    assert jnp.allclose(out, ref, atol=2e-3, rtol=2e-3), "mismatch vs reference"

    print("KERNEL_OK")
</pallas_src>

<mosaic_0001>
module attributes {stable_mosaic.version = 11 : i64} {
  func.func @_fused_cross_view_kernel(%arg0: i32, %arg1: memref<16x256xf32, #tpu.memory_space<vmem>>, %arg2: memref<24x16xbf16, #tpu.memory_space<vmem>>, %arg3: memref<24x1xf32, #tpu.memory_space<vmem>>, %arg4: memref<16x8xbf16, #tpu.memory_space<vmem>>, %arg5: memref<16x1xf32, #tpu.memory_space<vmem>>, %arg6: memref<16x16xbf16, #tpu.memory_space<vmem>>, %arg7: memref<16x1xf32, #tpu.memory_space<vmem>>, %arg8: memref<16x16xbf16, #tpu.memory_space<vmem>>, %arg9: memref<16x1xf32, #tpu.memory_space<vmem>>, %arg10: memref<16x1xf32, #tpu.memory_space<vmem>>, %arg11: memref<16x1xf32, #tpu.memory_space<vmem>>, %arg12: memref<16x256xf32, #tpu.memory_space<vmem>>, %arg13: memref<24x4x64xbf16, #tpu.memory_space<vmem>>, %arg14: memref<8x256xbf16, #tpu.memory_space<vmem>>) attributes {dimension_semantics = [#tpu.dimension_semantics<parallel>], iteration_bounds = array<i64: 2>, scalar_prefetch = 0 : i64, scratch_operands = 2 : i64, tpu.core_type = #tpu.core_type<tc>, window_params = [{transform_indices = @transform_0, window_bounds = array<i64: 16, 256>}, {pipeline_mode = #tpu.pipeline_mode<synchronous>, transform_indices = @transform_1, window_bounds = array<i64: 24, 16>}, {pipeline_mode = #tpu.pipeline_mode<synchronous>, transform_indices = @transform_2, window_bounds = array<i64: 24, 1>}, {pipeline_mode = #tpu.pipeline_mode<synchronous>, transform_indices = @transform_3, window_bounds = array<i64: 16, 8>}, {pipeline_mode = #tpu.pipeline_mode<synchronous>, transform_indices = @transform_4, window_bounds = array<i64: 16, 1>}, {pipeline_mode = #tpu.pipeline_mode<synchronous>, transform_indices = @transform_5, window_bounds = array<i64: 16, 16>}, {pipeline_mode = #tpu.pipeline_mode<synchronous>, transform_indices = @transform_6, window_bounds = array<i64: 16, 1>}, {pipeline_mode = #tpu.pipeline_mode<synchronous>, transform_indices = @transform_7, window_bounds = array<i64: 16, 16>}, {pipeline_mode = #tpu.pipeline_mode<synchronous>, transform_indices = @transform_8, window_bounds = array<i64: 16, 1>}, {pipeline_mode = #tpu.pipeline_mode<synchronous>, transform_indices = @transform_9, window_bounds = array<i64: 16, 1>}, {pipeline_mode = #tpu.pipeline_mode<synchronous>, transform_indices = @transform_10, window_bounds = array<i64: 16, 1>}, {transform_indices = @transform_11, window_bounds = array<i64: 16, 256>}]} {
    %c0 = arith.constant 0 : index
    %c0_0 = arith.constant 0 : index
    %0 = vector.load %arg1[%c0, %c0_0] : memref<16x256xf32, #tpu.memory_space<vmem>>, vector<16x256xf32>
    %1 = arith.truncf %0 : vector<16x256xf32> to vector<16x256xbf16>
    %c0_1 = arith.constant 0 : index
    %c0_2 = arith.constant 0 : index
    %2 = vector.load %arg2[%c0_1, %c0_2] : memref<24x16xbf16, #tpu.memory_space<vmem>>, vector<24x16xbf16>
    %cst = arith.constant dense<0.000000e+00> : vector<24x256xf32>
    %3 = tpu.matmul %2, %1, %cst {dimension_numbers = #tpu.dot_dimension_numbers<[1], [0], [0], [1], [0, 0, 1, 1], [], []>} : vector<24x16xbf16>, vector<16x256xbf16>, vector<24x256xf32> -> vector<24x256xf32>
    %c0_3 = arith.constant 0 : index
    %c0_4 = arith.constant 0 : index
    %4 = vector.load %arg3[%c0_3, %c0_4] : memref<24x1xf32, #tpu.memory_space<vmem>>, vector<24x1xf32>
    %5 = vector.broadcast %4 : vector<24x1xf32> to vector<24x256xf32>
    %6 = arith.addf %3, %5 : vector<24x256xf32>
    %7 = arith.truncf %6 : vector<24x256xf32> to vector<24x256xbf16>
    %8 = vector.extract_strided_slice %7 {offsets = [0, 0], sizes = [24, 64], strides = [1, 1]} : vector<24x256xbf16> to vector<24x64xbf16>
    %c0_5 = arith.constant 0 : index
    %c0_6 = arith.constant 0 : index
    %c0_7 = arith.constant 0 : index
    %9 = vector.load %arg13[%c0_5, %c0_6, %c0_7] : memref<24x4x64xbf16, #tpu.memory_space<vmem>>, vector<24x1x64xbf16>
    %10 = vector.shape_cast %9 : vector<24x1x64xbf16> to vector<24x64xbf16>
    %11 = vector.shape_cast %8 : vector<24x64xbf16> to vector<24x1x64xbf16>
    tpu.vector_store %arg13[%c0_5, %c0_6, %c0_7], %11 {strides = array<i32>} : memref<24x4x64xbf16, #tpu.memory_space<vmem>>, vector<24x1x64xbf16>,
    %12 = vector.extract_strided_slice %7 {offsets = [0, 64], sizes = [24, 64], strides = [1, 1]} : vector<24x256xbf16> to vector<24x64xbf16>
    %c0_8 = arith.constant 0 : index
    %c1 = arith.constant 1 : index
    %c0_9 = arith.constant 0 : index
    %13 = vector.load %arg13[%c0_8, %c1, %c0_9] : memref<24x4x64xbf16, #tpu.memory_space<vmem>>, vector<24x1x64xbf16>
    %14 = vector.shape_cast %13 : vector<24x1x64xbf16> to vector<24x64xbf16>
    %15 = vector.shape_cast %12 : vector<24x64xbf16> to vector<24x1x64xbf16>
    tpu.vector_store %arg13[%c0_8, %c1, %c0_9], %15 {strides = array<i32>} : memref<24x4x64xbf16, #tpu.memory_space<vmem>>, vector<24x1x64xbf16>,
    %16 = vector.extract_strided_slice %7 {offsets = [0, 128], sizes = [24, 64], strides = [1, 1]} : vector<24x256xbf16> to vector<24x64xbf16>
    %c0_10 = arith.constant 0 : index
    %c2 = arith.constant 2 : index
    %c0_11 = arith.constant 0 : index
    %17 = vector.load %arg13[%c0_10, %c2, %c0_11] : memref<24x4x64xbf16, #tpu.memory_space<vmem>>, vector<24x1x64xbf16>
    %18 = vector.shape_cast %17 : vector<24x1x64xbf16> to vector<24x64xbf16>
    %19 = vector.shape_cast %16 : vector<24x64xbf16> to vector<24x1x64xbf16>
    tpu.vector_store %arg13[%c0_10, %c2, %c0_11], %19 {strides = array<i32>} : memref<24x4x64xbf16, #tpu.memory_space<vmem>>, vector<24x1x64xbf16>,
    %20 = vector.extract_strided_slice %7 {offsets = [0, 192], sizes = [24, 64], strides = [1, 1]} : vector<24x256xbf16> to vector<24x64xbf16>
    %c0_12 = arith.constant 0 : index
    %c3 = arith.constant 3 : index
    %c0_13 = arith.constant 0 : index
    %21 = vector.load %arg13[%c0_12, %c3, %c0_13] : memref<24x4x64xbf16, #tpu.memory_space<vmem>>, vector<24x1x64xbf16>
    %22 = vector.shape_cast %21 : vector<24x1x64xbf16> to vector<24x64xbf16>
    %23 = vector.shape_cast %20 : vector<24x64xbf16> to vector<24x1x64xbf16>
    tpu.vector_store %arg13[%c0_12, %c3, %c0_13], %23 {strides = array<i32>} : memref<24x4x64xbf16, #tpu.memory_space<vmem>>, vector<24x1x64xbf16>,
    %c0_14 = arith.constant 0 : index
    %c0_15 = arith.constant 0 : index
    %c0_16 = arith.constant 0 : index
    %24 = vector.load %arg13[%c0_14, %c0_15, %c0_16] : memref<24x4x64xbf16, #tpu.memory_space<vmem>>, vector<4x4x64xbf16>
    %c8 = arith.constant 8 : index
    %c0_17 = arith.constant 0 : index
    %c0_18 = arith.constant 0 : index
    %25 = vector.load %arg13[%c8, %c0_17, %c0_18] : memref<24x4x64xbf16, #tpu.memory_space<vmem>>, vector<4x4x64xbf16>
    %c16 = arith.constant 16 : index
    %c0_19 = arith.constant 0 : index
    %c0_20 = arith.constant 0 : index
    %26 = vector.load %arg13[%c16, %c0_19, %c0_20] : memref<24x4x64xbf16, #tpu.memory_space<vmem>>, vector<4x4x64xbf16>
    %cst_21 = arith.constant dense<0.000000e+00> : vector<4x4x4xf32>
    %27 = tpu.matmul %24, %25, %cst_21 {dimension_numbers = #tpu.dot_dimension_numbers<[2], [2], [1], [1], [0, 0, 0, 1, 1, 1], [0], [0]>} : vector<4x4x64xbf16>, vector<4x4x64xbf16>, vector<4x4x4xf32> -> vector<4x4x4xf32>
    %cst_22 = arith.constant dense<0.000000e+00> : vector<4x4xf32>
    %28 = vector.multi_reduction <add>, %27, %cst_22 [0] : vector<4x4x4xf32> to vector<4x4xf32>
    %cst_23 = arith.constant dense<0xFF800000> : vector<4xf32>
    %29 = vector.multi_reduction <maximumf>, %28, %cst_23 [1] : vector<4x4xf32> to vector<4xf32>
    %30 = vector.shape_cast %29 : vector<4xf32> to vector<4x1xf32>
    %31 = vector.broadcast %30 : vector<4x1xf32> to vector<4x4xf32>
    %32 = arith.subf %28, %31 : vector<4x4xf32>
    %33 = math.exp %32 : vector<4x4xf32>
    %cst_24 = arith.constant dense<0.000000e+00> : vector<4xf32>
    %34 = vector.multi_reduction <add>, %33, %cst_24 [1] : vector<4x4xf32> to vector<4xf32>
    %35 = vector.shape_cast %34 : vector<4xf32> to vector<4x1xf32>
    %36 = vector.broadcast %35 : vector<4x1xf32> to vector<4x4xf32>
    %37 = arith.divf %33, %36 : vector<4x4xf32>
    %38 = arith.truncf %37 : vector<4x4xf32> to vector<4x4xbf16>
    %39 = vector.shape_cast %38 : vector<4x4xbf16> to vector<1x4x4xbf16>
    %40 = vector.broadcast %39 : vector<1x4x4xbf16> to vector<4x4x4xbf16>
    %cst_25 = arith.constant dense<0.000000e+00> : vector<4x4x64xf32>
    %41 = tpu.matmul %40, %26, %cst_25 {dimension_numbers = #tpu.dot_dimension_numbers<[2], [1], [1], [2], [0, 0, 0, 1, 1, 2], [0], [0]>} : vector<4x4x4xbf16>, vector<4x4x64xbf16>, vector<4x4x64xf32> -> vector<4x4x64xf32>
    %42 = arith.truncf %41 : vector<4x4x64xf32> to vector<4x4x64xbf16>
    %43 = vector.extract_strided_slice %42 {offsets = [0, 0, 0], sizes = [4, 1, 64], strides = [1, 1, 1]} : vector<4x4x64xbf16> to vector<4x1x64xbf16>
    %44 = vector.shape_cast %43 : vector<4x1x64xbf16> to vector<4x64xbf16>
    %c0_26 = arith.constant 0 : index
    %c0_27 = arith.constant 0 : index
    %45 = vector.load %arg14[%c0_26, %c0_27] : memref<8x256xbf16, #tpu.memory_space<vmem>>, vector<4x64xbf16>
    tpu.vector_store %arg14[%c0_26, %c0_27], %44 {strides = array<i32>} : memref<8x256xbf16, #tpu.memory_space<vmem>>, vector<4x64xbf16>,
    %46 = vector.extract_strided_slice %42 {offsets = [0, 1, 0], sizes = [4, 1, 64], strides = [1, 1, 1]} : vector<4x4x64xbf16> to vector<4x1x64xbf16>
    %47 = vector.shape_cast %46 : vector<4x1x64xbf16> to vector<4x64xbf16>
    %c0_28 = arith.constant 0 : index
    %c64 = arith.constant 64 : index
    %48 = vector.load %arg14[%c0_28, %c64] : memref<8x256xbf16, #tpu.memory_space<vmem>>, vector<4x64xbf16>
    tpu.vector_store %arg14[%c0_28, %c64], %47 {strides = array<i32>} : memref<8x256xbf16, #tpu.memory_space<vmem>>, vector<4x64xbf16>,
    %49 = vector.extract_strided_slice %42 {offsets = [0, 2, 0], sizes = [4, 1, 64], strides = [1, 1, 1]} : vector<4x4x64xbf16> to vector<4x1x64xbf16>
    %50 = vector.shape_cast %49 : vector<4x1x64xbf16> to vector<4x64xbf16>
    %c0_29 = arith.constant 0 : index
    %c128 = arith.constant 128 : index
    %51 = vector.load %arg14[%c0_29, %c128] : memref<8x256xbf16, #tpu.memory_space<vmem>>, vector<4x64xbf16>
    tpu.vector_store %arg14[%c0_29, %c128], %50 {strides = array<i32>} : memref<8x256xbf16, #tpu.memory_space<vmem>>, vector<4x64xbf16>,
    %52 = vector.extract_strided_slice %42 {offsets = [0, 3, 0], sizes = [4, 1, 64], strides = [1, 1, 1]} : vector<4x4x64xbf16> to vector<4x1x64xbf16>
    %53 = vector.shape_cast %52 : vector<4x1x64xbf16> to vector<4x64xbf16>
    %c0_30 = arith.constant 0 : index
    %c192 = arith.constant 192 : index
    %54 = vector.load %arg14[%c0_30, %c192] : memref<8x256xbf16, #tpu.memory_space<vmem>>, vector<4x64xbf16>
    tpu.vector_store %arg14[%c0_30, %c192], %53 {strides = array<i32>} : memref<8x256xbf16, #tpu.memory_space<vmem>>, vector<4x64xbf16>,
    %c4 = arith.constant 4 : index
    %c0_31 = arith.constant 0 : index
    %c0_32 = arith.constant 0 : index
    %55 = vector.load %arg13[%c4, %c0_31, %c0_32] : memref<24x4x64xbf16, #tpu.memory_space<vmem>>, vector<4x4x64xbf16>
    %c12 = arith.constant 12 : index
    %c0_33 = arith.constant 0 : index
    %c0_34 = arith.constant 0 : index
    %56 = vector.load %arg13[%c12, %c0_33, %c0_34] : memref<24x4x64xbf16, #tpu.memory_space<vmem>>, vector<4x4x64xbf16>
    %c20 = arith.constant 20 : index
    %c0_35 = arith.constant 0 : index
    %c0_36 = arith.constant 0 : index
    %57 = vector.load %arg13[%c20, %c0_35, %c0_36] : memref<24x4x64xbf16, #tpu.memory_space<vmem>>, vector<4x4x64xbf16>
    %cst_37 = arith.constant dense<0.000000e+00> : vector<4x4x4xf32>
    %58 = tpu.matmul %55, %56, %cst_37 {dimension_numbers = #tpu.dot_dimension_numbers<[2], [2], [1], [1], [0, 0, 0, 1, 1, 1], [0], [0]>} : vector<4x4x64xbf16>, vector<4x4x64xbf16>, vector<4x4x4xf32> -> vector<4x4x4xf32>
    %cst_38 = arith.constant dense<0.000000e+00> : vector<4x4xf32>
    %59 = vector.multi_reduction <add>, %58, %cst_38 [0] : vector<4x4x4xf32> to vector<4x4xf32>
    %cst_39 = arith.constant dense<0xFF800000> : vector<4xf32>
    %60 = vector.multi_reduction <maximumf>, %59, %cst_39 [1] : vector<4x4xf32> to vector<4xf32>
    %61 = vector.shape_cast %60 : vector<4xf32> to vector<4x1xf32>
    %62 = vector.broadcast %61 : vector<4x1xf32> to vector<4x4xf32>
    %63 = arith.subf %59, %62 : vector<4x4xf32>
    %64 = math.exp %63 : vector<4x4xf32>
    %cst_40 = arith.constant dense<0.000000e+00> : vector<4xf32>
    %65 = vector.multi_reduction <add>, %64, %cst_40 [1] : vector<4x4xf32> to vector<4xf32>
    %66 = vector.shape_cast %65 : vector<4xf32> to vector<4x1xf32>
    %67 = vector.broadcast %66 : vector<4x1xf32> to vector<4x4xf32>
    %68 = arith.divf %64, %67 : vector<4x4xf32>
    %69 = arith.truncf %68 : vector<4x4xf32> to vector<4x4xbf16>
    %70 = vector.shape_cast %69 : vector<4x4xbf16> to vector<1x4x4xbf16>
    %71 = vector.broadcast %70 : vector<1x4x4xbf16> to vector<4x4x4xbf16>
    %cst_41 = arith.constant dense<0.000000e+00> : vector<4x4x64xf32>
    %72 = tpu.matmul %71, %57, %cst_41 {dimension_numbers = #tpu.dot_dimension_numbers<[2], [1], [1], [2], [0, 0, 0, 1, 1, 2], [0], [0]>} : vector<4x4x4xbf16>, vector<4x4x64xbf16>, vector<4x4x64xf32> -> vector<4x4x64xf32>
    %73 = arith.truncf %72 : vector<4x4x64xf32> to vector<4x4x64xbf16>
    %74 = vector.extract_strided_slice %73 {offsets = [0, 0, 0], sizes = [4, 1, 64], strides = [1, 1, 1]} : vector<4x4x64xbf16> to vector<4x1x64xbf16>
    %75 = vector.shape_cast %74 : vector<4x1x64xbf16> to vector<4x64xbf16>
    %c4_42 = arith.constant 4 : index
    %c0_43 = arith.constant 0 : index
    %76 = vector.load %arg14[%c4_42, %c0_43] : memref<8x256xbf16, #tpu.memory_space<vmem>>, vector<4x64xbf16>
    tpu.vector_store %arg14[%c4_42, %c0_43], %75 {strides = array<i32>} : memref<8x256xbf16, #tpu.memory_space<vmem>>, vector<4x64xbf16>,
    %77 = vector.extract_strided_slice %73 {offsets = [0, 1, 0], sizes = [4, 1, 64], strides = [1, 1, 1]} : vector<4x4x64xbf16> to vector<4x1x64xbf16>
    %78 = vector.shape_cast %77 : vector<4x1x64xbf16> to vector<4x64xbf16>
    %c4_44 = arith.constant 4 : index
    %c64_45 = arith.constant 64 : index
    %79 = vector.load %arg14[%c4_44, %c64_45] : memref<8x256xbf16, #tpu.memory_space<vmem>>, vector<4x64xbf16>
    tpu.vector_store %arg14[%c4_44, %c64_45], %78 {strides = array<i32>} : memref<8x256xbf16, #tpu.memory_space<vmem>>, vector<4x64xbf16>,
    %80 = vector.extract_strided_slice %73 {offsets = [0, 2, 0], sizes = [4, 1, 64], strides = [1, 1, 1]} : vector<4x4x64xbf16> to vector<4x1x64xbf16>
    %81 = vector.shape_cast %80 : vector<4x1x64xbf16> to vector<4x64xbf16>
    %c4_46 = arith.constant 4 : index
    %c128_47 = arith.constant 128 : index
    %82 = vector.load %arg14[%c4_46, %c128_47] : memref<8x256xbf16, #tpu.memory_space<vmem>>, vector<4x64xbf16>
    tpu.vector_store %arg14[%c4_46, %c128_47], %81 {strides = array<i32>} : memref<8x256xbf16, #tpu.memory_space<vmem>>, vector<4x64xbf16>,
    %83 = vector.extract_strided_slice %73 {offsets = [0, 3, 0], sizes = [4, 1, 64], strides = [1, 1, 1]} : vector<4x4x64xbf16> to vector<4x1x64xbf16>
    %84 = vector.shape_cast %83 : vector<4x1x64xbf16> to vector<4x64xbf16>
    %c4_48 = arith.constant 4 : index
    %c192_49 = arith.constant 192 : index
    %85 = vector.load %arg14[%c4_48, %c192_49] : memref<8x256xbf16, #tpu.memory_space<vmem>>, vector<4x64xbf16>
    tpu.vector_store %arg14[%c4_48, %c192_49], %84 {strides = array<i32>} : memref<8x256xbf16, #tpu.memory_space<vmem>>, vector<4x64xbf16>,
    %c0_50 = arith.constant 0 : index
    %c0_51 = arith.constant 0 : index
    %86 = vector.load %arg14[%c0_50, %c0_51] : memref<8x256xbf16, #tpu.memory_space<vmem>>, vector<8x256xbf16>
    %c0_52 = arith.constant 0 : index
    %c0_53 = arith.constant 0 : index
    %87 = vector.load %arg4[%c0_52, %c0_53] : memref<16x8xbf16, #tpu.memory_space<vmem>>, vector<16x8xbf16>
    %cst_54 = arith.constant dense<0.000000e+00> : vector<16x256xf32>
    %88 = tpu.matmul %87, %86, %cst_54 {dimension_numbers = #tpu.dot_dimension_numbers<[1], [0], [0], [1], [0, 0, 1, 1], [], []>} : vector<16x8xbf16>, vector<8x256xbf16>, vector<16x256xf32> -> vector<16x256xf32>
    %c0_55 = arith.constant 0 : index
    %c0_56 = arith.constant 0 : index
    %89 = vector.load %arg5[%c0_55, %c0_56] : memref<16x1xf32, #tpu.memory_space<vmem>>, vector<16x1xf32>
    %90 = vector.broadcast %89 : vector<16x1xf32> to vector<16x256xf32>
    %91 = arith.addf %88, %90 : vector<16x256xf32>
    %92 = arith.addf %91, %0 : vector<16x256xf32>
    %c0_57 = arith.constant 0 : index
    %c0_58 = arith.constant 0 : index
    %93 = vector.load %arg6[%c0_57, %c0_58] : memref<16x16xbf16, #tpu.memory_space<vmem>>, vector<16x16xbf16>
    %94 = arith.truncf %92 : vector<16x256xf32> to vector<16x256xbf16>
    %cst_59 = arith.constant dense<0.000000e+00> : vector<16x256xf32>
    %95 = tpu.matmul %93, %94, %cst_59 {dimension_numbers = #tpu.dot_dimension_numbers<[1], [0], [0], [1], [0, 0, 1, 1], [], []>} : vector<16x16xbf16>, vector<16x256xbf16>, vector<16x256xf32> -> vector<16x256xf32>
    %c0_60 = arith.constant 0 : index
    %c0_61 = arith.constant 0 : index
    %96 = vector.load %arg7[%c0_60, %c0_61] : memref<16x1xf32, #tpu.memory_space<vmem>>, vector<16x1xf32>
    %97 = vector.broadcast %96 : vector<16x1xf32> to vector<16x256xf32>
    %98 = arith.addf %95, %97 : vector<16x256xf32>
    %cst_62 = arith.constant 5.000000e-01 : f32
    %99 = vector.broadcast %cst_62 : f32 to vector<16x256xf32>
    %100 = arith.mulf %99, %98 : vector<16x256xf32>
    %cst_63 = arith.constant 4.471500e-02 : f32
    %101 = vector.broadcast %cst_63 : f32 to vector<16x256xf32>
    %102 = arith.mulf %101, %98 : vector<16x256xf32>
    %103 = arith.mulf %102, %98 : vector<16x256xf32>
    %104 = arith.mulf %103, %98 : vector<16x256xf32>
    %105 = arith.addf %98, %104 : vector<16x256xf32>
    %cst_64 = arith.constant 0.797884583 : f32
    %106 = vector.broadcast %cst_64 : f32 to vector<16x256xf32>
    %107 = arith.mulf %106, %105 : vector<16x256xf32>
    %108 = math.tanh %107 : vector<16x256xf32>
    %cst_65 = arith.constant 1.000000e+00 : f32
    %109 = vector.broadcast %cst_65 : f32 to vector<16x256xf32>
    %110 = arith.addf %109, %108 : vector<16x256xf32>
    %111 = arith.mulf %100, %110 : vector<16x256xf32>
    %c0_66 = arith.constant 0 : index
    %c0_67 = arith.constant 0 : index
    %112 = vector.load %arg8[%c0_66, %c0_67] : memref<16x16xbf16, #tpu.memory_space<vmem>>, vector<16x16xbf16>
    %113 = arith.truncf %111 : vector<16x256xf32> to vector<16x256xbf16>
    %cst_68 = arith.constant dense<0.000000e+00> : vector<16x256xf32>
    %114 = tpu.matmul %112, %113, %cst_68 {dimension_numbers = #tpu.dot_dimension_numbers<[1], [0], [0], [1], [0, 0, 1, 1], [], []>} : vector<16x16xbf16>, vector<16x256xbf16>, vector<16x256xf32> -> vector<16x256xf32>
    %c0_69 = arith.constant 0 : index
    %c0_70 = arith.constant 0 : index
    %115 = vector.load %arg9[%c0_69, %c0_70] : memref<16x1xf32, #tpu.memory_space<vmem>>, vector<16x1xf32>
    %116 = vector.broadcast %115 : vector<16x1xf32> to vector<16x256xf32>
    %117 = arith.addf %114, %116 : vector<16x256xf32>
    %c0_71 = arith.constant 0 : index
    %c0_72 = arith.constant 0 : index
    %118 = vector.load %arg10[%c0_71, %c0_72] : memref<16x1xf32, #tpu.memory_space<vmem>>, vector<16x1xf32>
    %119 = vector.broadcast %118 : vector<16x1xf32> to vector<16x256xf32>
    %120 = arith.mulf %117, %119 : vector<16x256xf32>
    %c0_73 = arith.constant 0 : index
    %c0_74 = arith.constant 0 : index
    %121 = vector.load %arg11[%c0_73, %c0_74] : memref<16x1xf32, #tpu.memory_space<vmem>>, vector<16x1xf32>
    %122 = vector.broadcast %121 : vector<16x1xf32> to vector<16x256xf32>
    %123 = arith.addf %120, %122 : vector<16x256xf32>
    %c0_75 = arith.constant 0 : index
    %c0_76 = arith.constant 0 : index
    %124 = vector.load %arg12[%c0_75, %c0_76] : memref<16x256xf32, #tpu.memory_space<vmem>>, vector<16x256xf32>
    tpu.vector_store %arg12[%c0_75, %c0_76], %123 {strides = array<i32>} : memref<16x256xf32, #tpu.memory_space<vmem>>, vector<16x256xf32>,
    return
  }
  func.func @transform_0(%arg0: i32) -> (i32, i32) {
    %c0_i32 = arith.constant 0 : i32
    %c0_i32_0 = arith.constant 0 : i32
    return %c0_i32, %arg0 : i32, i32
  }
  func.func @transform_1(%arg0: i32) -> (i32, i32) {
    %c0_i32 = arith.constant 0 : i32
    %c0_i32_0 = arith.constant 0 : i32
    %c0_i32_1 = arith.constant 0 : i32
    return %c0_i32, %c0_i32_0 : i32, i32
  }
  func.func @transform_2(%arg0: i32) -> (i32, i32) {
    %c0_i32 = arith.constant 0 : i32
    %c0_i32_0 = arith.constant 0 : i32
    %c0_i32_1 = arith.constant 0 : i32
    return %c0_i32, %c0_i32_0 : i32, i32
  }
  func.func @transform_3(%arg0: i32) -> (i32, i32) {
    %c0_i32 = arith.constant 0 : i32
    %c0_i32_0 = arith.constant 0 : i32
    %c0_i32_1 = arith.constant 0 : i32
    return %c0_i32, %c0_i32_0 : i32, i32
  }
  func.func @transform_4(%arg0: i32) -> (i32, i32) {
    %c0_i32 = arith.constant 0 : i32
    %c0_i32_0 = arith.constant 0 : i32
    %c0_i32_1 = arith.constant 0 : i32
    return %c0_i32, %c0_i32_0 : i32, i32
  }
  func.func @transform_5(%arg0: i32) -> (i32, i32) {
    %c0_i32 = arith.constant 0 : i32
    %c0_i32_0 = arith.constant 0 : i32
    %c0_i32_1 = arith.constant 0 : i32
    return %c0_i32, %c0_i32_0 : i32, i32
  }
  func.func @transform_6(%arg0: i32) -> (i32, i32) {
    %c0_i32 = arith.constant 0 : i32
    %c0_i32_0 = arith.constant 0 : i32
    %c0_i32_1 = arith.constant 0 : i32
    return %c0_i32, %c0_i32_0 : i32, i32
  }
  func.func @transform_7(%arg0: i32) -> (i32, i32) {
    %c0_i32 = arith.constant 0 : i32
    %c0_i32_0 = arith.constant 0 : i32
    %c0_i32_1 = arith.constant 0 : i32
    return %c0_i32, %c0_i32_0 : i32, i32
  }
  func.func @transform_8(%arg0: i32) -> (i32, i32) {
    %c0_i32 = arith.constant 0 : i32
    %c0_i32_0 = arith.constant 0 : i32
    %c0_i32_1 = arith.constant 0 : i32
    return %c0_i32, %c0_i32_0 : i32, i32
  }
  func.func @transform_9(%arg0: i32) -> (i32, i32) {
    %c0_i32 = arith.constant 0 : i32
    %c0_i32_0 = arith.constant 0 : i32
    %c0_i32_1 = arith.constant 0 : i32
    return %c0_i32, %c0_i32_0 : i32, i32
  }
  func.func @transform_10(%arg0: i32) -> (i32, i32) {
    %c0_i32 = arith.constant 0 : i32
    %c0_i32_0 = arith.constant 0 : i32
    %c0_i32_1 = arith.constant 0 : i32
    return %c0_i32, %c0_i32_0 : i32, i32
  }
  func.func @transform_11(%arg0: i32) -> (i32, i32) {
    %c0_i32 = arith.constant 0 : i32
    %c0_i32_0 = arith.constant 0 : i32
    return %c0_i32, %arg0 : i32, i32
  }
}

</mosaic_0001>

<bundles_post_ra>
// kernel: tpu_custom_call.1
= control target key start
LH: loop header
LB: loop body
LE: loop exit
PB: predicated region body
PF: predicated region fallthrough
CT: control target
= control target key end

     0   :  { %s4186_s0 = inlined_call_operand.vmem [shape: f32[16,512], index: 0, kind: input, shape index: {}]   ;;  %s4187_s1 = inlined_call_operand.vmem [shape: bf16[24,16], index: 1, kind: input, shape index: {}]   ;;  %s4188_s2 = inlined_call_operand.vmem [shape: f32[24,1], index: 2, kind: input, shape index: {}]   ;;  %s4189_s3 = inlined_call_operand.vmem [shape: bf16[16,8], index: 3, kind: input, shape index: {}]   ;;  %s4190_s4 = inlined_call_operand.vmem [shape: f32[16,1], index: 4, kind: input, shape index: {}]   ;;  %s4191_s5 = inlined_call_operand.vmem [shape: bf16[16,16], index: 5, kind: input, shape index: {}]   ;;  %s4192_s6 = inlined_call_operand.vmem [shape: f32[16,1], index: 6, kind: input, shape index: {}]   ;;  %s4193_s7 = inlined_call_operand.vmem [shape: bf16[16,16], index: 7, kind: input, shape index: {}]   ;;  %s4194_s8 = inlined_call_operand.vmem [shape: f32[16,1], index: 8, kind: input, shape index: {}]   ;;  %s4195_s9 = inlined_call_operand.vmem [shape: f32[16,1], index: 9, kind: input, shape index: {}]   ;;  %s4196_s10 = inlined_call_operand.vmem [shape: f32[16,1], index: 10, kind: input, shape index: {}]   ;;  %s4197_s11 = inlined_call_operand.hbm [shape: f32[16,512], index: 11, kind: output, shape index: {}]  }
   0x1   :  { %4200 = sst [smem:[#allocation8_spill]] %s4186_s0 }
   0x2   :  { %16 = vsyncpa [#allocation6], 0 }
   0x3   :  { %18 = vsyncpa [#allocation6 + $0x1], 0  ;;  %s3301_s17 = smov 0   ;;  %s3303_s18 = smov 0  }
   0x4   :  { %s3305_s19 = smov 0   ;;  %s3307_s20 = smov 0  }
   0x5 LB: > { %s4199_s21 = sadd.s32 4294967295, %s3229_s20   ;;  %s2877_s22 = sadd.s32 4294967294, %s3229_s20   ;;  %s3229_s20 = sphi %s3307_s20, %s4217_s20   ;;  %s3225_s19 = sphi %s3305_s19, %s4216_s19   ;;  %s3221_s18 = sphi %s3303_s18, %s4215_s18   ;;  %s3217_s17 = sphi %s3301_s17, %s4214_s17  }
   0x6   : > { %s3324_s23 = sadd.s32 1, %s3229_s20   ;;  %s31_s24 = sadd.s32 1, %s3225_s19 }
   0x7   : > { %s28_s25 = ssub.s32 %s3229_s20, %s3324_s23  ;;  %p38_p0 = scmp.ne.s32.totalorder %s3225_s19, %s3221_s18 }
   0x8   : > { %p29_p1 = scmp.eq.s32.totalorder %s28_s25, 0  ;;  %p39_p2 = scmp.eq.s32.totalorder %s3229_s20, 0 }
   0x9   : > { %p278_p3 = scmp.eq.s32.totalorder %s4199_s21, 1  ;;  %p283_p4 = scmp.ne.s32.totalorder %s3221_s18, %s3217_s17 }
   0xa   : > { %s3337_s26 = scalar_select %p29_p1, %s3225_s19, %s31_s24  }
   0xb   : > { %p40_p5 = por %p39_p2, %p38_p0  ;;  %p3339_p6 = por %p278_p3, %p38_p0 }
   0xc   : > { %p284_p7 = scmp.eq.s32.totalorder %s2877_s22, 1  ;;  %p2879_p9 = scmp.ge.s32.totalorder %s3229_s20, 2 }
   0xe   : > { %p3343_p8 = por %p284_p7, %p283_p4  ;;  %330 = sbr.rel (%p2879_p9) target bundleno = 31 (0x1f), region = 56 }
  0x13   : > { %333 = sbr.rel (!%p40_p5) target bundleno = 31 (0x1f), region = 60  ;;  %s335_s29 = sand.u32 (%p40_p5), 1, %s3225_s19  }
  0x14   : > { %s2954_s30 = sshll.u32 (%p40_p5), %s3229_s20, 4  ;;  %s2880_s12 = sshll.u32 (%p40_p5), %s335_s29, 5 }
  0x15   : > { %s4203_s0 = sld [smem:[#allocation8_spill]] (%p40_p5)  ;;  %s337_s16 = scalar_lea.vmem (%p40_p5), [#allocation4], %s2880_s12 }
  0x1b   : > { %s340_s15 = scalar_lea.vmem %s4203_s0, %s2954_s30 }
  0x1c   : > { %v353_v0 = vld [vmem:[%s340_s15] sm:$0xff]  ;;  %v355_v1 = vld [vmem:[%s340_s15 + $0x8] sm:$0xff] }
  0x1d   : > { %v357_v2 = vld [vmem:[%s340_s15 + $0x20] sm:$0xff]  ;;  %354 = vst [vmem:[%s337_s16] sm:$0xff] %v353_v0  ;;  %356 = vst [vmem:[%s337_s16 + $0x8] sm:$0xff] %v355_v1  ;;  %v359_v3 = vld [vmem:[%s340_s15 + $0x28] sm:$0xff] }
  0x1e   : > { %358 = vst [vmem:[%s337_s16 + $0x10] sm:$0xff] %v357_v2  ;;  %360 = vst [vmem:[%s337_s16 + $0x18] sm:$0xff] %v359_v3 }
  0x1f PF: > { %p2883_p10 = scmp.ge.s32.totalorder %s3229_s20, 1  ;;  %p365_p11 = scmp.lt.s32.totalorder %s3229_s20, 3 }
  0x21   : > { %p366_p12 = pnand %p2883_p10, %p365_p11 }
  0x22   : > { %s4198_s22 = sand.u32 (!%p366_p12), 1, %s3221_s18   ;;  %s3234_s29 = smov (!%p366_p12), 64  }
  0x23   : > { %369 = sbr.rel (%p366_p12) target bundleno = 2463 (0x99f), region = 83  ;;  %s3360_s24 = sshll.u32 (!%p366_p12), %s4198_s22, 5 }
  0x24   : > { %s3372_s13 = scalar_lea.vmem (!%p366_p12), [#allocation4], %s3360_s24  ;;  %s410_s12 = scalar_lea.vmem (!%p366_p12), [#allocation5], %s3360_s24 }
  0x25   : > { %s2809_s22 = sshll.u32 (!%p366_p12), %s410_s12, 4  ;;  %s4213_s15 = sand.u32 (!%p366_p12), 1, %s3221_s18   ;;  %s4136_s22 = int_to_ptr.vmem [resolvable:$true] %s2809_s22 }
  0x26   : > { %s4145_s16 = scalar_lea.sflag (!%p366_p12), [#allocation6], %s4213_s15  ;;  %s3169_s25 = scalar_lea.vmem (!%p366_p12), %s4136_s22, 512 }
  0x27   : > { %p3170_p13 = scmp.ne.s32.totalorder (!%p366_p12), %s4136_s22, %s3169_s25 }
  0x28   : > { %v3231_v4 = vmov 0   ;;  %v424_v5 = vld [vmem:[%s4188_s2 + $0x8] sm:$0xff]  ;;  %v423_v6 = vld [vmem:[%s4188_s2] sm:$0xff]  ;;  %v417_v8 = vld [vmem:[%s3372_s13 + $0x18] sm:$0xff]  ;;  %vm449_vm0 = vcmask 130048   ;;  %v517_v18 = vlaneseq  ;;  %vm826_vm1 = vcmask 516096  }
  0x29   : > { %488 = vmatprep.mubr.bf16.mxu0 %v3231_v4  ;;  %3140 = vset.pattern.permute.xlu0 %v3231_v4  ;;  %v415_v7 = vld [vmem:[%s3372_s13 + $0x8] sm:$0xff]  ;;  %v414_v9 = vld [vmem:[%s3372_s13] sm:$0xff]  ;;  %v416_v11 = vld [vmem:[%s3372_s13 + $0x10] sm:$0xff]  ;;  %v3232_v16 = vmov 1966171168   ;;  %vm1362_vm3 = vcmask 517121   ;;  %p3171_p0 = pnand %p3170_p13, %p3339_p6 }
  0x2a   : > { %433 = vperm.xlu0 %3140, %v424_v5   ;;  %3141 = vset.pattern.permute.xlu1 %v3231_v4  ;;  %v419_v10 = vpack.c.bf16 %v417_v8, %v415_v7  ;;  %v418_v12 = vpack.c.bf16 %v416_v11, %v414_v9  ;;  %v3142_v13 = vld [vmem:[%s4187_s1] sm:$0xff]   ;;  %v3143_v14 = vld [vmem:[%s4187_s1 + $0x8] ss:$0 sps:$4 sm:$0xff]   ;;  %v515_v17 = vunpack.c.l.s4 %v3232_v16  ;;  %v518_v21 = vshrl.u32 %v517_v18, 7  ;;  %v853_v56 = vld [vmem:[#allocation2 + $0x10] sm:$0x1] }
  0x2b   : > { %v3233_v24 = vmov 857870592   ;;  %vm827_vm2 = vsmask.f32 256  ;;  %vm1363_vm4 = vsmask.f32 1280  ;;  %p3172_p1 = pneg %p3171_p0 }
  0x2c   : > { %470 = vmatprep.subr.bf16.mxu0 %v419_v10  ;;  %v516_v20 = vunpack.c.0.s8 %v515_v17  ;;  %v635_v25 = vunpack.c.l.s4 %v3233_v24  ;;  %vm3419_vm5 = vmand %vm826_vm1, %vm827_vm2  ;;  %v829_v57 = vld [vmem:[#allocation2] sm:$0x1]  ;;  %v1389_v1 = vld [vmem:[#allocation2 + $0x10] sm:$0x2]  ;;  %vm3236_vm7 = vmmov 0   ;;  %vm1597_vm12 = vcmask 523264  }
  0x2d   : > { %471 = vmatpush1.bf16.msra.mxu0 %v418_v12  ;;  %vm3446_vm6 = vmand %vm1362_vm3, %vm1363_vm4  ;;  %v1365_v7 = vld [vmem:[#allocation2] sm:$0x2]  ;;  %v859_v9 = vld [vmem:[#allocation2 + $0x14] sm:$0x1]  ;;  %vm973_vm8 = vsmask.f32 7938 }
  0x2e   : > { %428 = vperm.xlu0 %3140, %v423_v6   ;;  %v3387_v29 = vsub.s32 %v516_v20, %v518_v21  ;;  %v636_v30 = vunpack.c.0.s8 %v635_v25  ;;  %v1395_v25 = vld [vmem:[#allocation2 + $0x14] sm:$0x2]  ;;  %vm3683_vm9 = vmand %vm826_vm1, %vm973_vm8  ;;  %vm1509_vm10 = vsmask.f32 7942  ;;  %vm1782_vm13 = vcmask 27648  }
  0x2f   : > { %vm3692_vm11 = vmand %vm1362_vm3, %vm1509_vm10  ;;  %vm1806_vm14 = vcmask 1041408   ;;  %vm1802_vm15 = vcmask 31744   ;;  %vm2000_vm1 = vcmask 1041409   ;;  %vm2003_vm2 = vcmask 1042434  }
  0x30   : > { %2888 = vmatmul.mubr.msk.bf16.vlgmr.msra.gmra.mxu0 %vm449_vm0, %v3142_v13  ;;  %v3391_v40 = vsub.s32 %v636_v30, %v518_v21  ;;  %v856_v13 = vld [vmem:[#allocation2 + $0x12] sm:$0x1]  ;;  %vm2006_vm3 = vcmask 1043459   ;;  %vm2010_vm4 = vcmask 517120   ;;  %vm2465_vm8 = vcmask 1047559  }
  0x31   : > { %498 = vmatprep.mubr.bf16.mxu0 %v3231_v4  ;;  %vm2482_vm10 = vcmask 1043970  }
  0x38   : > { %2889 = vmatmul.mubr.msk.bf16.gmra.mxu0 %vm449_vm0, %v3143_v14 }
  0xa5   : > { %v434_v15 = vpop.permute.xlu0 %433 }
  0xa9   : > { %v429_v22 = vpop.permute.xlu0 %428 }
  0xf0   : > { %v490_v19 = vpop.f32.mrf.mxu0 }
  0xf1   : > { %v491_v27 = vadd.f32 %v490_v19, %v429_v22 }
  0xf2   : > { %v492_v23 = vpop.f32.mrf.mxu0 }
  0xf3   : > { %v493_v32 = vadd.f32 %v492_v23, %v429_v22  ;;  %v1392_v23 = vld [vmem:[#allocation2 + $0x12] sm:$0x2] }
  0xf4   : > { %v494_v26 = vpop.f32.mrf.mxu0 }
  0xf5   : > { %v495_v28 = vadd.f32 %v494_v26, %v434_v15 }
  0xf6   : > { %v496_v31 = vpop.f32.mrf.mxu0 }
  0xf7   : > { %v507_v33 = vpack.c.bf16 %v495_v28, %v491_v27  ;;  %v2890_v34 = vpack.c.bf16 %v495_v28, %v495_v28  ;;  %v497_v35 = vadd.f32 %v496_v31, %v434_v15  ;;  %v832_v28 = vld [vmem:[#allocation2 + $0x2] sm:$0x1] }
  0xf9   : > { %v520_v36 = vrot.slane %v507_v33, %v3387_v29  ;;  %v527_v37 = vrot.slane %v2890_v34, %v3387_v29  ;;  %v508_v38 = vpack.c.bf16 %v497_v35, %v493_v32  ;;  %v2903_v39 = vpack.c.bf16 %v497_v35, %v497_v35 }
  0xfb   : > { %v528_v41 = vcombine.high %v520_v36, %v520_v36  ;;  %v529_v42 = vcombine.high %v527_v37, %v527_v37  ;;  %v3394_v43 = vrot.slane %v520_v36, %v3387_v29  ;;  %v3397_v44 = vrot.slane %v527_v37, %v3387_v29 }
  0xfc   : > { %v1056_v45 = vrot.slane %v508_v38, %v3387_v29  ;;  %v1063_v46 = vrot.slane %v2903_v39, %v3387_v29  ;;  %v1368_v38 = vld [vmem:[#allocation2 + $0x2] sm:$0x2] }
  0xfd   : > { %v3402_v47 = vrot.slane %v528_v41, %v3387_v29  ;;  %v3405_v48 = vrot.slane %v529_v42, %v3387_v29  ;;  %v2895_v49 = vpack.i.b16 %v3397_v44, %v3397_v44  ;;  %v2891_v50 = vpack.i.b16 %v3394_v43, %v3394_v43  ;;  %v835_v41 = vld [vmem:[#allocation2 + $0x4] sm:$0x1] }
  0xfe   : > { %v1064_v51 = vcombine.high %v1056_v45, %v1056_v45  ;;  %v1065_v52 = vcombine.high %v1063_v46, %v1063_v46  ;;  %v3412_v53 = vrot.slane %v1056_v45, %v3387_v29  ;;  %v3415_v54 = vrot.slane %v1063_v46, %v3387_v29 }
  0xff   : > { %v696_v58 = vrot.slane %v2895_v49, %v3391_v40  ;;  %v640_v59 = vrot.slane %v2891_v50, %v3391_v40  ;;  %v595_v60 = vunpack.i.h.s16 %v3397_v44  ;;  %v2896_v61 = vpack.i.b16 %v3405_v48, %v3405_v48  ;;  %v862_v49 = vld [vmem:[#allocation2 + $0x16] sm:$0x1] }
 0x100   : > { %v3429_v62 = vrot.slane %v1064_v51, %v3387_v29  ;;  %v3432_v63 = vrot.slane %v1065_v52, %v3387_v29  ;;  %v2908_v0 = vpack.i.b16 %v3415_v54, %v3415_v54  ;;  %v2904_v2 = vpack.i.b16 %v3412_v53, %v3412_v53 }
 0x101   : > { %917 = vrot.lane.b32.xlu1 %v696_v58, %s3234_s29  ;;  %v854_v3 = vsel %vm3419_vm5, %v696_v58, %v853_v56  ;;  %901 = vrot.lane.b32.xlu0 %v640_v59, %s3234_s29  ;;  %v830_v5 = vsel %vm3419_vm5, %v640_v59, %v829_v57  ;;  %v619_v8 = vpack.i.b16 %v595_v60, %v595_v60  ;;  %v1131_v10 = vunpack.i.h.s16 %v3415_v54  ;;  %v1398_v56 = vld [vmem:[#allocation2 + $0x16] sm:$0x2] }
 0x102   : > { %855 = vst [vmem:[#allocation2 + $0x10] sm:$0x1] %v854_v3  ;;  %831 = vst [vmem:[#allocation2] sm:$0x1] %v830_v5  ;;  %v1232_v11 = vrot.slane %v2908_v0, %v3391_v40  ;;  %v1176_v12 = vrot.slane %v2904_v2, %v3391_v40  ;;  %v710_v14 = vrot.slane %v2896_v61, %v3391_v40  ;;  %v587_v15 = vunpack.i.h.s16 %v3394_v43  ;;  %v1371_v2 = vld [vmem:[#allocation2 + $0x4] sm:$0x2] }
 0x103   : > { %v703_v16 = vrot.slane %v619_v8, %v3391_v40  ;;  %v1155_v17 = vpack.i.b16 %v1131_v10, %v1131_v10  ;;  %v2909_v18 = vpack.i.b16 %v3432_v63, %v3432_v63  ;;  %v1123_v19 = vunpack.i.h.s16 %v3412_v53 }
 0x104   : > { %v1390_v20 = vsel %vm3446_vm6, %v1232_v11, %v1389_v1  ;;  %v1366_v21 = vsel %vm3446_vm6, %v1176_v12, %v1365_v7  ;;  %v860_v22 = vsel %vm3419_vm5, %v710_v14, %v859_v9  ;;  %v611_v24 = vpack.i.b16 %v587_v15, %v587_v15  ;;  %v838_v1 = vld [vmem:[#allocation2 + $0x6] sm:$0x1] }
 0x105   : > { %1391 = vst [vmem:[#allocation2 + $0x10] sm:$0x2] %v1390_v20  ;;  %1453 = vrot.lane.b32.xlu1 %v1232_v11, %s3234_s29  ;;  %1367 = vst [vmem:[#allocation2] sm:$0x2] %v1366_v21  ;;  %1437 = vrot.lane.b32.xlu0 %v1176_v12, %s3234_s29  ;;  %v857_v26 = vsel %vm3419_vm5, %v703_v16, %v856_v13  ;;  %v1239_v27 = vrot.slane %v1155_v17, %v3391_v40  ;;  %v597_v31 = vunpack.i.h.s16 %v3405_v48  ;;  %v3235_v9 = vmov 0.0  }
 0x106   : > { %861 = vst [vmem:[#allocation2 + $0x14] sm:$0x1] %v860_v22  ;;  %v3471_v30 = vrot.slane %v2909_v18, %v3391_v40  ;;  %858 = vst [vmem:[#allocation2 + $0x12] sm:$0x1] %v857_v26  ;;  %v647_v32 = vrot.slane %v611_v24, %v3391_v40  ;;  %v1147_v33 = vpack.i.b16 %v1123_v19, %v1123_v19  ;;  %v1133_v35 = vunpack.i.h.s16 %v3432_v63  ;;  %v1374_v11 = vld [vmem:[#allocation2 + $0x6] sm:$0x2] }
 0x107   : > { %v2892_v34 = vpack.i.b16 %v3402_v47, %v3402_v47  ;;  %v1393_v36 = vsel %vm3446_vm6, %v1239_v27, %v1392_v23  ;;  %v621_v39 = vpack.i.b16 %v597_v31, %v597_v31  ;;  %v589_v42 = vunpack.i.h.s16 %v3402_v47  ;;  %2996 = vmatprep.subr.bf16.mxu1 %v3235_v9  ;;  %3008 = vmatprep.subr.bf16.mxu0 %v3235_v9  ;;  %v865_v19 = vld [vmem:[#allocation2 + $0x18] sm:$0x1]  ;;  %v841_v20 = vld [vmem:[#allocation2 + $0x8] sm:$0x1] }
 0x108   : > { %v1396_v37 = vsel %vm3446_vm6, %v3471_v30, %v1395_v25  ;;  %1394 = vst [vmem:[#allocation2 + $0x12] sm:$0x2] %v1393_v36  ;;  %v833_v45 = vsel %vm3419_vm5, %v647_v32, %v832_v28  ;;  %v1183_v46 = vrot.slane %v1147_v33, %v3391_v40  ;;  %v1157_v51 = vpack.i.b16 %v1133_v35, %v1133_v35  ;;  %v1401_v36 = vld [vmem:[#allocation2 + $0x18] sm:$0x2] }
 0x109   : > { %1397 = vst [vmem:[#allocation2 + $0x14] sm:$0x2] %v1396_v37  ;;  %v3488_v50 = vrot.slane %v2892_v34, %v3391_v40  ;;  %919 = vrot.lane.b32.xlu1 %v703_v16, %s3234_s29  ;;  %921 = vrot.lane.b32.xlu0 %v710_v14, %s3234_s29  ;;  %834 = vst [vmem:[#allocation2 + $0x2] sm:$0x1] %v833_v45  ;;  %v3493_v52 = vrot.slane %v621_v39, %v3391_v40  ;;  %v1125_v59 = vunpack.i.h.s16 %v3429_v62 }
 0x10a   : > { %v613_v57 = vpack.i.b16 %v589_v42, %v589_v42  ;;  %v2905_v58 = vpack.i.b16 %v3429_v62, %v3429_v62  ;;  %v1369_v60 = vsel %vm3446_vm6, %v1183_v46, %v1368_v38  ;;  %v3504_v0 = vrot.slane %v1157_v51, %v3391_v40  ;;  %2998 = vmatprep.mubr.msk.bf16.mxu1 %vm3236_vm7, %v3235_v9  ;;  %v1407_v51 = vld [vmem:[#allocation2 + $0x1c] sm:$0x2] }
 0x10b   : > { %v836_v61 = vsel %vm3419_vm5, %v3488_v50, %v835_v41  ;;  %1370 = vst [vmem:[#allocation2 + $0x2] sm:$0x2] %v1369_v60  ;;  %v863_v3 = vsel %vm3419_vm5, %v3493_v52, %v862_v49  ;;  %v1149_v8 = vpack.i.b16 %v1125_v59, %v1125_v59  ;;  %v559_v12 = vcombine.high %v3397_v44, %v3397_v44  ;;  %v871_v41 = vld [vmem:[#allocation2 + $0x1c] sm:$0x1] }
 0x10c   : > { %837 = vst [vmem:[#allocation2 + $0x4] sm:$0x1] %v836_v61  ;;  %v3510_v5 = vrot.slane %v613_v57, %v3391_v40  ;;  %v3513_v7 = vrot.slane %v2905_v58, %v3391_v40  ;;  %864 = vst [vmem:[#allocation2 + $0x16] sm:$0x1] %v863_v3  ;;  %v1399_v10 = vsel %vm3446_vm6, %v3504_v0, %v1398_v56  ;;  %3010 = vmatprep.mubr.msk.bf16.mxu0 %vm3236_vm7, %v3235_v9 }
 0x10d   : > { %v3524_v13 = vcombine.high %v3394_v43, %v3394_v43  ;;  %v3528_v14 = vcombine.high %v3412_v53, %v3412_v53  ;;  %1455 = vrot.lane.b32.xlu1 %v1239_v27, %s3234_s29  ;;  %903 = vrot.lane.b32.xlu0 %v647_v32, %s3234_s29  ;;  %1400 = vst [vmem:[#allocation2 + $0x16] sm:$0x2] %v1399_v10  ;;  %v599_v16 = vunpack.i.h.s16 %v559_v12  ;;  %v1377_v27 = vld [vmem:[#allocation2 + $0x8] sm:$0x2]  ;;  %v874_v10 = vld [vmem:[#allocation2 + $0x1e] sm:$0x1] }
 0x10e   : > { %v839_v15 = vsel %vm3419_vm5, %v3510_v5, %v838_v1  ;;  %v1372_v44 = vsel %vm3446_vm6, %v3513_v7, %v1371_v2  ;;  %v3539_v43 = vrot.slane %v1149_v8, %v3391_v40  ;;  %v2897_v53 = vpack.i.b16 %v559_v12, %v559_v12 }
 0x10f   : > { %840 = vst [vmem:[#allocation2 + $0x6] sm:$0x1] %v839_v15  ;;  %1373 = vst [vmem:[#allocation2 + $0x4] sm:$0x2] %v1372_v44  ;;  %v2893_v17 = vpack.i.b16 %v3524_v13, %v3524_v13  ;;  %v2906_v21 = vpack.i.b16 %v3528_v14, %v3528_v14  ;;  %v1095_v22 = vcombine.high %v3415_v54, %v3415_v54  ;;  %v591_v23 = vunpack.i.h.s16 %v3524_v13  ;;  %v868_v54 = vld [vmem:[#allocation2 + $0x1a] sm:$0x1] }
 0x110   : > { %v1375_v18 = vsel %vm3446_vm6, %v3539_v43, %v1374_v11  ;;  %v3556_v24 = vrot.slane %v2897_v53, %v3391_v40  ;;  %v623_v25 = vpack.i.b16 %v599_v16, %v599_v16  ;;  %v561_v28 = vcombine.high %v3405_v48, %v3405_v48  ;;  %v1410_v11 = vld [vmem:[#allocation2 + $0x1e] sm:$0x2]  ;;  %v844_v53 = vld [vmem:[#allocation2 + $0xa] sm:$0x1]  ;;  %v1380_v16 = vld [vmem:[#allocation2 + $0xa] sm:$0x2] }
 0x111   : > { %1376 = vst [vmem:[#allocation2 + $0x6] sm:$0x2] %v1375_v18  ;;  %v3559_v26 = vrot.slane %v2893_v17, %v3391_v40  ;;  %1457 = vrot.lane.b32.xlu1 %v3471_v30, %s3234_s29  ;;  %1439 = vrot.lane.b32.xlu0 %v1183_v46, %s3234_s29  ;;  %v3567_v31 = vrot.slane %v2906_v21, %v3391_v40  ;;  %v1135_v33 = vunpack.i.h.s16 %v1095_v22  ;;  %v1404_v46 = vld [vmem:[#allocation2 + $0x1a] sm:$0x2]  ;;  %v1127_v61 = vunpack.i.h.s16 %v3528_v14  ;;  %v1383_v17 = vld [vmem:[#allocation2 + $0xc] sm:$0x2] }
 0x112   : > { %v2910_v32 = vpack.i.b16 %v1095_v22, %v1095_v22  ;;  %v1097_v34 = vcombine.high %v3432_v63, %v3432_v63  ;;  %v866_v35 = vsel %vm3419_vm5, %v3556_v24, %v865_v19  ;;  %v3575_v48 = vrot.slane %v623_v25, %v3391_v40 }
 0x113   : > { %v842_v30 = vsel %vm3419_vm5, %v3559_v26, %v841_v20  ;;  %v2898_v37 = vpack.i.b16 %v561_v28, %v561_v28  ;;  %867 = vst [vmem:[#allocation2 + $0x18] sm:$0x1] %v866_v35  ;;  %v1378_v38 = vsel %vm3446_vm6, %v3567_v31, %v1377_v27  ;;  %v1159_v39 = vpack.i.b16 %v1135_v33, %v1135_v33  ;;  %v847_v33 = vld [vmem:[#allocation2 + $0xc] sm:$0x1] }
 0x114   : > { %843 = vst [vmem:[#allocation2 + $0x8] sm:$0x1] %v842_v30  ;;  %v3584_v63 = vrot.slane %v2910_v32, %v3391_v40  ;;  %v2911_v42 = vpack.i.b16 %v1097_v34, %v1097_v34  ;;  %v869_v45 = vsel %vm3419_vm5, %v3575_v48, %v868_v54  ;;  %1379 = vst [vmem:[#allocation2 + $0x8] sm:$0x2] %v1378_v38  ;;  %v601_v56 = vunpack.i.h.s16 %v561_v28 }
 0x115   : > { %v3590_v49 = vrot.slane %v2898_v37, %v3391_v40  ;;  %v1137_v57 = vunpack.i.h.s16 %v1097_v34  ;;  %923 = vrot.lane.b32.xlu1 %v3493_v52, %s3234_s29  ;;  %905 = vrot.lane.b32.xlu0 %v3488_v50, %s3234_s29  ;;  %870 = vst [vmem:[#allocation2 + $0x1a] sm:$0x1] %v869_v45  ;;  %v3600_v59 = vrot.slane %v1159_v39, %v3391_v40  ;;  %v3658_v34 = vpop.f32.mrf.mxu0  ;;  %v850_v37 = vld [vmem:[#allocation2 + $0xe] sm:$0x1]  ;;  %v425_v45 = vld [vmem:[%s4188_s2 + $0x10] sm:$0xff] }
 0x116   : > { %v1402_v58 = vsel %vm3446_vm6, %v3584_v63, %v1401_v36  ;;  %v3603_v60 = vrot.slane %v2911_v42, %v3391_v40  ;;  %v625_v1 = vpack.i.b16 %v601_v56, %v601_v56  ;;  %v1096_v2 = vcombine.high %v3429_v62, %v3429_v62  ;;  %v999_v56 = vld [vmem:[#allocation2 + $0x10] sm:$0x1] }
 0x117   : > { %1403 = vst [vmem:[#allocation2 + $0x18] sm:$0x2] %v1402_v58  ;;  %v872_v52 = vsel %vm3419_vm5, %v3590_v49, %v871_v41  ;;  %v1161_v50 = vpack.i.b16 %v1137_v57, %v1137_v57  ;;  %v1405_v3 = vsel %vm3446_vm6, %v3600_v59, %v1404_v46  ;;  %v615_v12 = vpack.i.b16 %v591_v23, %v591_v23  ;;  %v1386_v23 = vld [vmem:[#allocation2 + $0xe] sm:$0x2]  ;;  %v3666_v38 = vpop.f32.mrf.mxu0  ;;  %v975_v58 = vld [vmem:[#allocation2] sm:$0x1] }
 0x118   : > { %873 = vst [vmem:[#allocation2 + $0x1c] sm:$0x1] %v872_v52  ;;  %v1408_v8 = vsel %vm3446_vm6, %v3603_v60, %v1407_v51  ;;  %v1151_v13 = vpack.i.b16 %v1127_v61, %v1127_v61  ;;  %1406 = vst [vmem:[#allocation2 + $0x1a] sm:$0x2] %v1405_v3  ;;  %v3618_v14 = vrot.slane %v625_v1, %v3391_v40  ;;  %v1129_v44 = vunpack.i.h.s16 %v1096_v2  ;;  %v1511_v3 = vld [vmem:[#allocation2] sm:$0x2] }
 0x119   : > { %1409 = vst [vmem:[#allocation2 + $0x1c] sm:$0x2] %v1408_v8  ;;  %v3621_v62 = vrot.slane %v1161_v50, %v3391_v40  ;;  %v2907_v15 = vpack.i.b16 %v1096_v2, %v1096_v2  ;;  %1459 = vrot.lane.b32.xlu1 %v3504_v0, %s3234_s29  ;;  %907 = vrot.lane.b32.xlu0 %v3510_v5, %s3234_s29  ;;  %v504_v41 = vpop.f32.mrf.mxu0  ;;  %v1535_v50 = vld [vmem:[#allocation2 + $0x10] sm:$0x2] }
 0x11a   : > { %v3628_v18 = vrot.slane %v615_v12, %v3391_v40  ;;  %v3631_v19 = vrot.slane %v1151_v13, %v3391_v40  ;;  %v560_v20 = vcombine.high %v3402_v47, %v3402_v47  ;;  %v875_v21 = vsel %vm3419_vm5, %v3618_v14, %v874_v10  ;;  %v1002_v13 = vld [vmem:[#allocation2 + $0x12] sm:$0x1] }
 0x11b   : > { %v1411_v0 = vsel %vm3446_vm6, %v3621_v62, %v1410_v11  ;;  %v3642_v5 = vrot.slane %v2907_v15, %v3391_v40  ;;  %v1153_v22 = vpack.i.b16 %v1129_v44, %v1129_v44  ;;  %876 = vst [vmem:[#allocation2 + $0x1e] sm:$0x1] %v875_v21  ;;  %v505_v46 = vpop.f32.mrf.mxu0  ;;  %v1005_v15 = vld [vmem:[#allocation2 + $0x14] sm:$0x1] }
 0x11c   : > { %1412 = vst [vmem:[#allocation2 + $0x1e] sm:$0x2] %v1411_v0  ;;  %v845_v25 = vsel %vm3419_vm5, %v3628_v18, %v844_v53  ;;  %v1381_v47 = vsel %vm3446_vm6, %v3631_v19, %v1380_v16  ;;  %v2894_v27 = vpack.i.b16 %v560_v20, %v560_v20  ;;  %v593_v28 = vunpack.i.h.s16 %v560_v20  ;;  %v978_v0 = vld [vmem:[#allocation2 + $0x2] sm:$0x1] }
 0x11d   : > { %v1384_v54 = vsel %vm3446_vm6, %v3642_v5, %v1383_v17  ;;  %v3654_v32 = vrot.slane %v1153_v22, %v3391_v40  ;;  %846 = vst [vmem:[#allocation2 + $0xa] sm:$0x1] %v845_v25  ;;  %1382 = vst [vmem:[#allocation2 + $0xa] sm:$0x2] %v1381_v47  ;;  %1441 = vrot.lane.b32.xlu1 %v3513_v7, %s3234_s29  ;;  %v1538_v17 = vld [vmem:[#allocation2 + $0x12] sm:$0x2] }
 0x11e   : > { %1385 = vst [vmem:[#allocation2 + $0xc] sm:$0x2] %v1384_v54  ;;  %v3661_v35 = vrot.slane %v2894_v27, %v3391_v40  ;;  %v617_v30 = vpack.i.b16 %v593_v28, %v593_v28  ;;  %v1541_v27 = vld [vmem:[#allocation2 + $0x14] sm:$0x2]  ;;  %v1514_v54 = vld [vmem:[#allocation2 + $0x2] sm:$0x2] }
 0x11f   : > { %v1387_v36 = vsel %vm3446_vm6, %v3654_v32, %v1386_v23 }
 0x120   : > { %1388 = vst [vmem:[#allocation2 + $0xe] sm:$0x2] %v1387_v36  ;;  %v848_v39 = vsel %vm3419_vm5, %v3661_v35, %v847_v33  ;;  %v3672_v7 = vrot.slane %v617_v30, %v3391_v40 }
 0x121   : > { %849 = vst [vmem:[#allocation2 + $0xc] sm:$0x1] %v848_v39  ;;  %1443 = vrot.lane.b32.xlu1 %v3539_v43, %s3234_s29  ;;  %v1008_v39 = vld [vmem:[#allocation2 + $0x16] sm:$0x1] }
 0x122   : > { %v851_v42 = vsel %vm3419_vm5, %v3672_v7, %v850_v37 }
 0x123   : > { %852 = vst [vmem:[#allocation2 + $0xe] sm:$0x1] %v851_v42  ;;  %v981_v42 = vld [vmem:[#allocation2 + $0x4] sm:$0x1] }
 0x125   : > { %438 = vperm.xlu1 %3141, %v425_v45  }
 0x173   : > { %v918_v43 = vpop.permute.xlu1 %917  ;;  %v902_v57 = vpop.permute.xlu0 %901 }
 0x174   : > { %v1000_v61 = vsel %vm3683_vm9, %v918_v43, %v999_v56  ;;  %v976_v52 = vsel %vm3683_vm9, %v902_v57, %v975_v58  ;;  %v1544_v58 = vld [vmem:[#allocation2 + $0x16] sm:$0x2] }
 0x175   : > { %1001 = vst [vmem:[#allocation2 + $0x10] sm:$0x1] %v1000_v61  ;;  %977 = vst [vmem:[#allocation2] sm:$0x1] %v976_v52 }
 0x177   : > { %v1454_v2 = vpop.permute.xlu1 %1453  ;;  %v1438_v8 = vpop.permute.xlu0 %1437 }
 0x178   : > { %v1536_v10 = vsel %vm3692_vm11, %v1454_v2, %v1535_v50  ;;  %v1512_v11 = vsel %vm3692_vm11, %v1438_v8, %v1511_v3  ;;  %v984_v50 = vld [vmem:[#allocation2 + $0x6] sm:$0x1] }
 0x179   : > { %1537 = vst [vmem:[#allocation2 + $0x10] sm:$0x2] %v1536_v10  ;;  %1513 = vst [vmem:[#allocation2] sm:$0x2] %v1512_v11 }
 0x17b   : > { %v920_v12 = vpop.permute.xlu1 %919  ;;  %v922_v44 = vpop.permute.xlu0 %921 }
 0x17c   : > { %v1003_v53 = vsel %vm3683_vm9, %v920_v12, %v1002_v13  ;;  %v1006_v16 = vsel %vm3683_vm9, %v922_v44, %v1005_v15  ;;  %v1517_v12 = vld [vmem:[#allocation2 + $0x4] sm:$0x2] }
 0x17d   : > { %1004 = vst [vmem:[#allocation2 + $0x12] sm:$0x1] %v1003_v53  ;;  %1007 = vst [vmem:[#allocation2 + $0x14] sm:$0x1] %v1006_v16  ;;  %v1520_v53 = vld [vmem:[#allocation2 + $0x6] sm:$0x2] }
 0x17f   : > { %v1456_v20 = vpop.permute.xlu1 %1455  ;;  %v904_v21 = vpop.permute.xlu0 %903 }
 0x180   : > { %v1539_v22 = vsel %vm3692_vm11, %v1456_v20, %v1538_v17  ;;  %v979_v23 = vsel %vm3683_vm9, %v904_v21, %v978_v0  ;;  %v1588_v25 = vld [vmem:[#allocation2 + $0x10] sm:$0x3]  ;;  %v1583_v43 = vld [vmem:[#allocation2] sm:$0x3] }
 0x181   : > { %1540 = vst [vmem:[#allocation2 + $0x12] sm:$0x2] %v1539_v22  ;;  %980 = vst [vmem:[#allocation2 + $0x2] sm:$0x1] %v979_v23  ;;  %v1602_v47 = vsel %vm1597_vm12, %v1588_v25, 0 }
 0x182   : > { %2997 = vmatpush3.bf16.xpose.msra.mxu1 %v1602_v47 }
 0x183   : > { %v1458_v28 = vpop.permute.xlu1 %1457  ;;  %v1440_v33 = vpop.permute.xlu0 %1439  ;;  %3002 = vmatprep.subr.bf16.mxu1 %v3235_v9 }
 0x184   : > { %v1542_v30 = vsel %vm3692_vm11, %v1458_v28, %v1541_v27  ;;  %v1515_v36 = vsel %vm3692_vm11, %v1440_v33, %v1514_v54 }
 0x185   : > { %1543 = vst [vmem:[#allocation2 + $0x14] sm:$0x2] %v1542_v30  ;;  %1516 = vst [vmem:[#allocation2 + $0x2] sm:$0x2] %v1515_v36 }
 0x187   : > { %v924_v37 = vpop.permute.xlu1 %923  ;;  %v906_v41 = vpop.permute.xlu0 %905 }
 0x188   : > { %v1009_v45 = vsel %vm3683_vm9, %v924_v37, %v1008_v39  ;;  %v982_v46 = vsel %vm3683_vm9, %v906_v41, %v981_v42  ;;  %v1589_v56 = vld [vmem:[#allocation2 + $0x12] sm:$0x3]  ;;  %v1413_v39 = vld [vmem:[#allocation2 + $0x20] sm:$0x2]  ;;  %v883_v42 = vld [vmem:[#allocation2 + $0x24] sm:$0x1] }
 0x189   : > { %1010 = vst [vmem:[#allocation2 + $0x16] sm:$0x1] %v1009_v45  ;;  %983 = vst [vmem:[#allocation2 + $0x4] sm:$0x1] %v982_v46  ;;  %2999 = vmatmul.mubr.msk.bf16.vlgmr.msra.gmra.mxu1 %vm1597_vm12, %v1583_v43  ;;  %v1648_v57 = vsel %vm1597_vm12, %v1589_v56, 0 }
 0x18a   : > { %3003 = vmatpush3.bf16.xpose.msra.mxu1 %v1648_v57  ;;  %3004 = vmatprep.mubr.msk.bf16.mxu1 %vm3236_vm7, %v3235_v9  ;;  %v886_v56 = vld [vmem:[#allocation2 + $0x26] sm:$0x1] }
 0x18b   : > { %v1460_v61 = vpop.permute.xlu1 %1459  ;;  %v908_v52 = vpop.permute.xlu0 %907  ;;  %3014 = vmatprep.subr.bf16.mxu1 %v3235_v9 }
 0x18c   : > { %v1545_v2 = vsel %vm3692_vm11, %v1460_v61, %v1544_v58  ;;  %v985_v3 = vsel %vm3683_vm9, %v908_v52, %v984_v50  ;;  %v1590_v8 = vld [vmem:[#allocation2 + $0x14] sm:$0x3]  ;;  %v1584_v15 = vld [vmem:[#allocation2 + $0x2] sm:$0x3] }
 0x18d   : > { %1546 = vst [vmem:[#allocation2 + $0x16] sm:$0x2] %v1545_v2  ;;  %986 = vst [vmem:[#allocation2 + $0x6] sm:$0x1] %v985_v3  ;;  %v1694_v10 = vsel %vm1597_vm12, %v1590_v8, 0 }
 0x18e   : > { %3009 = vmatpush3.bf16.xpose.msra.mxu0 %v1694_v10  ;;  %v877_v2 = vld [vmem:[#allocation2 + $0x20] sm:$0x1] }
 0x18f   : > { %v1442_v11 = vpop.permute.xlu1 %1441  ;;  %3020 = vmatprep.subr.bf16.mxu0 %v3235_v9 }
 0x190   : > { %v1518_v13 = vsel %vm3692_vm11, %v1442_v11, %v1517_v12 }
 0x191   : > { %1519 = vst [vmem:[#allocation2 + $0x4] sm:$0x2] %v1518_v13  ;;  %3005 = vmatmul.mubr.msk.bf16.vlgmr.msra.gmra.mxu1 %vm1597_vm12, %v1584_v15 }
 0x192   : > { %3016 = vmatprep.mubr.msk.bf16.mxu1 %vm3236_vm7, %v3235_v9 }
 0x193   : > { %v1444_v44 = vpop.permute.xlu1 %1443 }
 0x194   : > { %v1521_v16 = vsel %vm3692_vm11, %v1444_v44, %v1520_v53  ;;  %v1591_v17 = vld [vmem:[#allocation2 + $0x16] sm:$0x3] }
 0x195   : > { %1522 = vst [vmem:[#allocation2 + $0x6] sm:$0x2] %v1521_v16  ;;  %v1740_v20 = vsel %vm1597_vm12, %v1591_v17, 0  ;;  %v880_v17 = vld [vmem:[#allocation2 + $0x22] sm:$0x1] }
 0x196   : > { %3015 = vmatpush3.bf16.xpose.msra.mxu1 %v1740_v20  ;;  %v1416_v20 = vld [vmem:[#allocation2 + $0x22] sm:$0x2] }
 0x197   : > { %3026 = vmatprep.subr.bf16.mxu1 %v3235_v9 }
 0x198   : > { %v1585_v21 = vld [vmem:[#allocation2 + $0x4] sm:$0x3] }
 0x199   : > { %3011 = vmatmul.mubr.msk.bf16.vlgmr.msra.gmra.mxu0 %vm1597_vm12, %v1585_v21  ;;  %v1419_v21 = vld [vmem:[#allocation2 + $0x24] sm:$0x2] }
 0x19a   : > { %3022 = vmatprep.mubr.msk.bf16.mxu0 %vm3236_vm7, %v3235_v9 }
 0x19c   : > { %v1586_v0 = vld [vmem:[#allocation2 + $0x6] sm:$0x3] }
 0x19d   : > { %3017 = vmatmul.mubr.msk.bf16.vlgmr.msra.gmra.mxu1 %vm1597_vm12, %v1586_v0 }
 0x19e   : > { %3028 = vmatprep.mubr.msk.bf16.mxu1 %vm3236_vm7, %v3235_v9 }
 0x1a0   : > { %v439_v22 = vpop.permute.xlu1 %438 }
 0x1a1   : > { %v501_v23 = vadd.f32 %v3658_v34, %v439_v22  ;;  %v503_v25 = vadd.f32 %v3666_v38, %v439_v22 }
 0x1a3   : > { %v509_v47 = vpack.c.bf16 %v501_v23, %v501_v23  ;;  %v510_v27 = vpack.c.bf16 %v503_v25, %v503_v25  ;;  %v1422_v25 = vld [vmem:[#allocation2 + $0x26] sm:$0x2] }
 0x1a5   : > { %v568_v28 = vrot.slane %v509_v47, %v3387_v29  ;;  %v1104_v54 = vrot.slane %v510_v27, %v3387_v29 }
 0x1a7   : > { %v569_v33 = vcombine.high %v568_v28, %v568_v28  ;;  %v1112_v30 = vrot.slane %v1104_v54, %v3387_v29  ;;  %v576_v52 = vrot.slane %v568_v28, %v3387_v29  ;;  %v1105_v3 = vcombine.high %v1104_v54, %v1104_v54 }
 0x1a9   : > { %v3750_v36 = vrot.slane %v569_v33, %v3387_v29  ;;  %v2912_v37 = vpack.i.b16 %v1112_v30, %v1112_v30  ;;  %v2899_v50 = vpack.i.b16 %v576_v52, %v576_v52  ;;  %v603_v10 = vunpack.i.h.s16 %v576_v52 }
 0x1aa   : > { %v584_v47 = vcombine.high %v576_v52, %v576_v52  ;;  %v1120_v27 = vcombine.high %v1112_v30, %v1112_v30 }
 0x1ab   : > { %v1288_v41 = vrot.slane %v2912_v37, %v3391_v40  ;;  %v2900_v34 = vpack.i.b16 %v3750_v36, %v3750_v36  ;;  %v605_v38 = vunpack.i.h.s16 %v3750_v36  ;;  %v3777_v8 = vrot.slane %v2899_v50, %v3391_v40 }
 0x1ac   : > { %v627_v11 = vpack.i.b16 %v603_v10, %v603_v10  ;;  %v2901_v33 = vpack.i.b16 %v584_v47, %v584_v47  ;;  %v1143_v37 = vunpack.i.h.s16 %v1120_v27 }
 0x1ad   : > { %1469 = vrot.lane.b32.xlu1 %v1288_v41, %s3234_s29  ;;  %v1414_v45 = vsel %vm3446_vm6, %v1288_v41, %v1413_v39  ;;  %v766_v46 = vrot.slane %v2900_v34, %v3391_v40  ;;  %v629_v43 = vpack.i.b16 %v605_v38, %v605_v38  ;;  %v889_v34 = vld [vmem:[#allocation2 + $0x28] sm:$0x1] }
 0x1ae   : > { %1415 = vst [vmem:[#allocation2 + $0x20] sm:$0x2] %v1414_v45  ;;  %v3784_v15 = vrot.slane %v627_v11, %v3391_v40  ;;  %v3808_v41 = vrot.slane %v2901_v33, %v3391_v40  ;;  %v1167_v38 = vpack.i.b16 %v1143_v37, %v1143_v37 }
 0x1af   : > { %v884_v57 = vsel %vm3419_vm5, %v766_v46, %v883_v42  ;;  %v773_v58 = vrot.slane %v629_v43, %v3391_v40  ;;  %v1431_v43 = vld [vmem:[#allocation2 + $0x2c] sm:$0x2] }
 0x1b0   : > { %885 = vst [vmem:[#allocation2 + $0x24] sm:$0x1] %v884_v57  ;;  %v3817_v45 = vrot.slane %v1167_v38, %v3391_v40  ;;  %v607_v57 = vunpack.i.h.s16 %v584_v47 }
 0x1b1   : > { %937 = vrot.lane.b32.xlu1 %v766_v46, %s3234_s29  ;;  %v887_v61 = vsel %vm3419_vm5, %v773_v58, %v886_v56  ;;  %v1428_v46 = vld [vmem:[#allocation2 + $0x2a] sm:$0x2]  ;;  %v2914_v56 = vpack.i.b16 %v1120_v27, %v1120_v27 }
 0x1b2   : > { %888 = vst [vmem:[#allocation2 + $0x26] sm:$0x1] %v887_v61  ;;  %v585_v61 = vcombine.high %v3750_v36, %v3750_v36  ;;  %v1429_v52 = vsel %vm3446_vm6, %v3817_v45, %v1428_v46  ;;  %v1014_v46 = vld [vmem:[#allocation2 + $0x1a] sm:$0x1] }
 0x1b3   : > { %v3828_v50 = vrot.slane %v2914_v56, %v3391_v40  ;;  %1430 = vst [vmem:[#allocation2 + $0x2a] sm:$0x2] %v1429_v52  ;;  %v1523_v52 = vld [vmem:[#allocation2 + $0x8] sm:$0x2] }
 0x1b4   : > { %v609_v10 = vunpack.i.h.s16 %v585_v61 }
 0x1b5   : > { %939 = vrot.lane.b32.xlu1 %v773_v58, %s3234_s29  ;;  %v1559_v27 = vld [vmem:[#allocation2 + $0x20] sm:$0x2] }
 0x1b9   : > { %925 = vrot.lane.b32.xlu1 %v3556_v24, %s3234_s29  ;;  %v878_v24 = vsel %vm3419_vm5, %v3777_v8, %v877_v2  ;;  %v631_v2 = vpack.i.b16 %v607_v57, %v607_v57  ;;  %v1032_v55 = vld [vmem:[#allocation2 + $0x26] sm:$0x1] }
 0x1ba   : > { %879 = vst [vmem:[#allocation2 + $0x20] sm:$0x1] %v878_v24  ;;  %v1425_v24 = vld [vmem:[#allocation2 + $0x28] sm:$0x2] }
 0x1bb   : > { %v3834_v36 = vrot.slane %v631_v2, %v3391_v40 }
 0x1bd   : > { %927 = vrot.lane.b32.xlu1 %v3575_v48, %s3234_s29  ;;  %v1119_v48 = vrot.slane %v1105_v3, %v3387_v29  ;;  %v881_v29 = vsel %vm3419_vm5, %v3784_v15, %v880_v17 }
 0x1be   : > { %882 = vst [vmem:[#allocation2 + $0x22] sm:$0x1] %v881_v29 }
 0x1bf   : > { %v1141_v13 = vunpack.i.h.s16 %v1119_v48  ;;  %v1121_v54 = vcombine.high %v1119_v48, %v1119_v48 }
 0x1c1   : > { %909 = vrot.lane.b32.xlu1 %v3559_v26, %s3234_s29  ;;  %v1139_v26 = vunpack.i.h.s16 %v1112_v30  ;;  %v1165_v16 = vpack.i.b16 %v1141_v13, %v1141_v13  ;;  %v2915_v39 = vpack.i.b16 %v1121_v54, %v1121_v54  ;;  %v890_v30 = vsel %vm3419_vm5, %v3808_v41, %v889_v34  ;;  %v895_v13 = vld [vmem:[#allocation2 + $0x2c] sm:$0x1]  ;;  %v1011_v34 = vld [vmem:[#allocation2 + $0x18] sm:$0x1] }
 0x1c2   : > { %891 = vst [vmem:[#allocation2 + $0x28] sm:$0x1] %v890_v30  ;;  %v1145_v3 = vunpack.i.h.s16 %v1121_v54 }
 0x1c3   : > { %v1163_v12 = vpack.i.b16 %v1139_v26, %v1139_v26  ;;  %v3802_v23 = vrot.slane %v1165_v16, %v3391_v40  ;;  %v3811_v42 = vrot.slane %v2915_v39, %v3391_v40  ;;  %v1426_v26 = vsel %vm3446_vm6, %v3828_v50, %v1425_v24 }
 0x1c4   : > { %v1169_v11 = vpack.i.b16 %v1145_v3, %v1145_v3  ;;  %1427 = vst [vmem:[#allocation2 + $0x28] sm:$0x2] %v1426_v26  ;;  %v633_v16 = vpack.i.b16 %v609_v10, %v609_v10 }
 0x1c5   : > { %1445 = vrot.lane.b32.xlu1 %v3567_v31, %s3234_s29  ;;  %v2913_v31 = vpack.i.b16 %v1119_v48, %v1119_v48  ;;  %v3787_v44 = vrot.slane %v1163_v12, %v3391_v40  ;;  %v1423_v28 = vsel %vm3446_vm6, %v3802_v23, %v1422_v25  ;;  %v1432_v58 = vsel %vm3446_vm6, %v3811_v42, %v1431_v43  ;;  %v892_v12 = vld [vmem:[#allocation2 + $0x2a] sm:$0x1] }
 0x1c6   : > { %1424 = vst [vmem:[#allocation2 + $0x26] sm:$0x2] %v1423_v28  ;;  %1433 = vst [vmem:[#allocation2 + $0x2c] sm:$0x2] %v1432_v58  ;;  %v2902_v48 = vpack.i.b16 %v585_v61, %v585_v61  ;;  %v893_v17 = vsel %vm3419_vm5, %v3834_v36, %v892_v12  ;;  %v3849_v29 = vrot.slane %v633_v16, %v3391_v40  ;;  %v987_v58 = vld [vmem:[#allocation2 + $0x8] sm:$0x1] }
 0x1c7   : > { %v3790_v53 = vrot.slane %v2913_v31, %v3391_v40  ;;  %v1417_v0 = vsel %vm3446_vm6, %v3787_v44, %v1416_v20  ;;  %v3843_v20 = vrot.slane %v1169_v11, %v3391_v40  ;;  %894 = vst [vmem:[#allocation2 + $0x2a] sm:$0x1] %v893_v17 }
 0x1c8   : > { %1418 = vst [vmem:[#allocation2 + $0x22] sm:$0x2] %v1417_v0  ;;  %v3837_v31 = vrot.slane %v2902_v48, %v3391_v40  ;;  %v898_v0 = vld [vmem:[#allocation2 + $0x2e] sm:$0x1]  ;;  %v1029_v40 = vld [vmem:[#allocation2 + $0x24] sm:$0x1] }
 0x1c9   : > { %v1420_v22 = vsel %vm3446_vm6, %v3790_v53, %v1419_v21  ;;  %v899_v25 = vsel %vm3419_vm5, %v3849_v29, %v898_v0 }
 0x1ca   : > { %1421 = vst [vmem:[#allocation2 + $0x24] sm:$0x2] %v1420_v22  ;;  %v896_v21 = vsel %vm3419_vm5, %v3837_v31, %v895_v13  ;;  %v1434_v22 = vld [vmem:[#allocation2 + $0x2e] sm:$0x2]  ;;  %900 = vst [vmem:[#allocation2 + $0x2e] sm:$0x1] %v899_v25 }
 0x1cb   : > { %897 = vst [vmem:[#allocation2 + $0x2c] sm:$0x1] %v896_v21  ;;  %v1435_v47 = vsel %vm3446_vm6, %v3843_v20, %v1434_v22  ;;  %vm2022_vm5 = vcmask 1041920   ;;  %vm2459_vm6 = vcmask 1045509  }
 0x1cc   : > { %1436 = vst [vmem:[#allocation2 + $0x2e] sm:$0x2] %v1435_v47 }
 0x21f   : > { %v1470_v28 = vpop.permute.xlu1 %1469 }
 0x220   : > { %v1560_v54 = vsel %vm3692_vm11, %v1470_v28, %v1559_v27 }
 0x221   : > { %1561 = vst [vmem:[#allocation2 + $0x20] sm:$0x2] %v1560_v54 }
 0x223   : > { %v938_v33 = vpop.permute.xlu1 %937 }
 0x224   : > { %v1030_v37 = vsel %vm3683_vm9, %v938_v33, %v1029_v40 }
 0x225   : > { %1031 = vst [vmem:[#allocation2 + $0x24] sm:$0x1] %v1030_v37 }
 0x227   : > { %v940_v39 = vpop.permute.xlu1 %939 }
 0x228   : > { %v1033_v6 = vsel %vm3683_vm9, %v940_v39, %v1032_v55 }
 0x229   : > { %1034 = vst [vmem:[#allocation2 + $0x26] sm:$0x1] %v1033_v6 }
 0x22b   : > { %v926_v38 = vpop.permute.xlu1 %925 }
 0x22c   : > { %v1012_v30 = vsel %vm3683_vm9, %v926_v38, %v1011_v34 }
 0x22d   : > { %1013 = vst [vmem:[#allocation2 + $0x18] sm:$0x1] %v1012_v30 }
 0x22f   : > { %v928_v43 = vpop.permute.xlu1 %927 }
 0x230   : > { %v1015_v56 = vsel %vm3683_vm9, %v928_v43, %v1014_v46  ;;  %v1568_v43 = vld [vmem:[#allocation2 + $0x26] sm:$0x2] }
 0x231   : > { %1016 = vst [vmem:[#allocation2 + $0x1a] sm:$0x1] %v1015_v56 }
 0x233   : > { %v910_v57 = vpop.permute.xlu1 %909 }
 0x234   : > { %v988_v61 = vsel %vm3683_vm9, %v910_v57, %v987_v58 }
 0x235   : > { %989 = vst [vmem:[#allocation2 + $0x8] sm:$0x1] %v988_v61 }
 0x237   : > { %v1446_v2 = vpop.permute.xlu1 %1445 }
 0x238   : > { %v1524_v3 = vsel %vm3692_vm11, %v1446_v2, %v1523_v52  ;;  %v1547_v52 = vld [vmem:[#allocation2 + $0x18] sm:$0x2] }
 0x239   : > { %1525 = vst [vmem:[#allocation2 + $0x8] sm:$0x2] %v1524_v3 }
 0x249   : > { %v1638_v24 = vpop.f32.mrf.mxu1 }
 0x24a   : > { %v1783_v0 = vsel %vm1782_vm13, %v1638_v24, 0.0  ;;  %v1550_v24 = vld [vmem:[#allocation2 + $0x1a] sm:$0x2] }
 0x24b   : > { %v3000_v48 = vpop.f32.mrf.mxu1 }
 0x24d   : > { %v1641_v10 = vpop.f32.mrf.mxu1 }
 0x24f   : > { %v3001_v26 = vpop.f32.mrf.mxu1 }
 0x250   : > { %v1017_v26 = vld [vmem:[#allocation2 + $0x1c] sm:$0x1] }
 0x251   : > { %v1684_v11 = vpop.f32.mrf.mxu1 }
 0x252   : > { %v1784_v17 = vsel %vm1782_vm13, %v1684_v11, 0.0 }
 0x253   : > { %v3006_v12 = vpop.f32.mrf.mxu1  ;;  %v1785_v25 = vadd.f32 %v1784_v17, %v1783_v0 }
 0x255   : > { %v1687_v13 = vpop.f32.mrf.mxu1 }
 0x256   : > { %v1553_v13 = vld [vmem:[#allocation2 + $0x1c] sm:$0x2] }
 0x257   : > { %v3007_v16 = vpop.f32.mrf.mxu1 }
 0x259   : > { %v1730_v21 = vpop.f32.mrf.mxu0 }
 0x25a   : > { %v1786_v22 = vsel %vm1782_vm13, %v1730_v21, 0.0  ;;  %v1020_v21 = vld [vmem:[#allocation2 + $0x1e] sm:$0x1] }
 0x25b   : > { %v3012_v47 = vpop.f32.mrf.mxu0  ;;  %v1787_v27 = vadd.f32 %v1786_v22, %v1785_v25  ;;  %v1556_v25 = vld [vmem:[#allocation2 + $0x1e] sm:$0x2] }
 0x25d   : > { %v1733_v28 = vpop.f32.mrf.mxu0  ;;  %v1776_v54 = vpop.f32.mrf.mxu1 }
 0x25e   : > { %v1788_v40 = vsel %vm1782_vm13, %v1776_v54, 0.0 }
 0x25f   : > { %v1789_v33 = vadd.f32 %v1788_v40, %v1787_v27  ;;  %v3013_v37 = vpop.f32.mrf.mxu0  ;;  %v3018_v55 = vpop.f32.mrf.mxu1 }
 0x260   : > { %v1035_v37 = vld [vmem:[#allocation2 + $0x28] sm:$0x1] }
 0x261   : > { %v1779_v39 = vpop.f32.mrf.mxu1  ;;  %v1790_v6 = vsel %vm1782_vm13, %v1789_v33, -inf }
 0x262   : > { %1791 = vmax.xlane.f32.xlu0 %v1790_v6  ;;  %v1574_v39 = vld [vmem:[#allocation2 + $0x2a] sm:$0x2] }
 0x263   : > { %v3019_v34 = vpop.f32.mrf.mxu1 }
 0x278   : > { %933 = vrot.lane.b32.xlu0 %v3777_v8, %s3234_s29 }
 0x27c   : > { %935 = vrot.lane.b32.xlu0 %v3784_v15, %s3234_s29  ;;  %v1562_v15 = vld [vmem:[#allocation2 + $0x22] sm:$0x2] }
 0x280   : > { %1471 = vrot.lane.b32.xlu0 %v3787_v44, %s3234_s29 }
 0x284   : > { %1473 = vrot.lane.b32.xlu0 %v3790_v53, %s3234_s29 }
 0x288   : > { %1475 = vrot.lane.b32.xlu0 %v3802_v23, %s3234_s29 }
 0x28c   : > { %1461 = vrot.lane.b32.xlu0 %v3584_v63, %s3234_s29 }
 0x290   : > { %1463 = vrot.lane.b32.xlu0 %v3600_v59, %s3234_s29 }
 0x294   : > { %929 = vrot.lane.b32.xlu0 %v3590_v49, %s3234_s29 }
 0x298   : > { %1465 = vrot.lane.b32.xlu0 %v3603_v60, %s3234_s29  ;;  %v1023_v60 = vld [vmem:[#allocation2 + $0x20] sm:$0x1] }
 0x29c   : > { %931 = vrot.lane.b32.xlu0 %v3618_v14, %s3234_s29 }
 0x2a0   : > { %1467 = vrot.lane.b32.xlu0 %v3621_v62, %s3234_s29 }
 0x2a4   : > { %1449 = vrot.lane.b32.xlu0 %v3642_v5, %s3234_s29  ;;  %v1026_v5 = vld [vmem:[#allocation2 + $0x22] sm:$0x1] }
 0x2a8   : > { %1451 = vrot.lane.b32.xlu0 %v3654_v32, %s3234_s29 }
 0x2ac   : > { %941 = vrot.lane.b32.xlu0 %v3808_v41, %s3234_s29 }
 0x2b0   : > { %1479 = vrot.lane.b32.xlu0 %v3817_v45, %s3234_s29 }
 0x2b4   : > { %1481 = vrot.lane.b32.xlu0 %v3811_v42, %s3234_s29  ;;  %v1565_v42 = vld [vmem:[#allocation2 + $0x24] sm:$0x2] }
 0x2eb   : > { %v1792_v63 = vpop.xlane.xlu0 %1791 }
 0x2ec   : > { %v1793_v49 = vsub.f32 %v1789_v33, %v1792_v63 }
 0x2ee   : > { %v1794_v59 = vmul.f32 1.442695, %v1793_v49 }
 0x2ef   : > { %v934_v14 = vpop.permute.xlu0 %933 }
 0x2f0   : > { %3149 = vpow2.f32 %v1794_v59  ;;  %v1024_v62 = vsel %vm3683_vm9, %v934_v14, %v1023_v60  ;;  %v990_v60 = vld [vmem:[#allocation2 + $0xa] sm:$0x1] }
 0x2f1   : > { %1025 = vst [vmem:[#allocation2 + $0x20] sm:$0x1] %v1024_v62 }
 0x2f3   : > { %v936_v32 = vpop.permute.xlu0 %935 }
 0x2f4   : > { %v1027_v8 = vsel %vm3683_vm9, %v936_v32, %v1026_v5  ;;  %v1526_v5 = vld [vmem:[#allocation2 + $0xa] sm:$0x2] }
 0x2f5   : > { %1028 = vst [vmem:[#allocation2 + $0x22] sm:$0x1] %v1027_v8 }
 0x2f7   : > { %v1472_v44 = vpop.permute.xlu0 %1471 }
 0x2f8   : > { %v1563_v53 = vsel %vm3692_vm11, %v1472_v44, %v1562_v15  ;;  %v1593_v23 = vld [vmem:[#allocation2 + $0x20] sm:$0x3]  ;;  %v993_v44 = vld [vmem:[#allocation2 + $0xc] sm:$0x1] }
 0x2f9   : > { %1564 = vst [vmem:[#allocation2 + $0x22] sm:$0x2] %v1563_v53  ;;  %v1808_v41 = vsel %vm1806_vm14, %v1593_v23, 0 }
 0x2fa   : > { %3021 = vmatpush3.bf16.msra.mxu0 %v1808_v41  ;;  %v996_v41 = vld [vmem:[#allocation2 + $0xe] sm:$0x1] }
 0x2fb   : > { %v1474_v45 = vpop.permute.xlu0 %1473  ;;  %3032 = vmatprep.subr.bf16.mxu0 %v3235_v9 }
 0x2fc   : > { %v1566_v38 = vsel %vm3692_vm11, %v1474_v45, %v1565_v42 }
 0x2fd   : > { %v3918_v30 = vpop.eup %3149  ;;  %1567 = vst [vmem:[#allocation2 + $0x24] sm:$0x2] %v1566_v38 }
 0x2fe   : > { %v1796_v46 = vsel %vm1782_vm13, %v3918_v30, 0.0 }
 0x2ff   : > { %1797 = vadd.xlane.f32.xlu1 %v1796_v46  ;;  %v1476_v56 = vpop.permute.xlu0 %1475 }
 0x300   : > { %v1569_v57 = vsel %vm3692_vm11, %v1476_v56, %v1568_v43  ;;  %v1594_v58 = vld [vmem:[#allocation2 + $0x22] sm:$0x3] }
 0x301   : > { %1570 = vst [vmem:[#allocation2 + $0x26] sm:$0x2] %v1569_v57  ;;  %v1851_v61 = vsel %vm1806_vm14, %v1594_v58, 0 }
 0x302   : > { %3027 = vmatpush3.bf16.msra.mxu1 %v1851_v61 }
 0x303   : > { %v1462_v2 = vpop.permute.xlu0 %1461  ;;  %3038 = vmatprep.subr.bf16.mxu1 %v3235_v9 }
 0x304   : > { %v1548_v3 = vsel %vm3692_vm11, %v1462_v2, %v1547_v52  ;;  %v1595_v38 = vld [vmem:[#allocation2 + $0x24] sm:$0x3] }
 0x305   : > { %1549 = vst [vmem:[#allocation2 + $0x18] sm:$0x2] %v1548_v3  ;;  %v1894_v57 = vsel %vm1806_vm14, %v1595_v38, 0 }
 0x307   : > { %v1464_v48 = vpop.permute.xlu0 %1463 }
 0x308   : > { %v1551_v10 = vsel %vm3692_vm11, %v1464_v48, %v1550_v24  ;;  %v1596_v46 = vld [vmem:[#allocation2 + $0x26] sm:$0x3]  ;;  %v2045_v48 = vld [vmem:[#allocation2 + $0x8] sm:$0x3] }
 0x309   : > { %1552 = vst [vmem:[#allocation2 + $0x1a] sm:$0x2] %v1551_v10  ;;  %v1937_v58 = vsel %vm1806_vm14, %v1596_v46, 0 }
 0x30b   : > { %v930_v11 = vpop.permute.xlu0 %929 }
 0x30c   : > { %v1018_v12 = vsel %vm3683_vm9, %v930_v11, %v1017_v26 }
 0x30d   : > { %1019 = vst [vmem:[#allocation2 + $0x1c] sm:$0x1] %v1018_v12 }
 0x30f   : > { %v1466_v16 = vpop.permute.xlu0 %1465 }
 0x310   : > { %v1554_v17 = vsel %vm3692_vm11, %v1466_v16, %v1553_v13  ;;  %911 = vrot.lane.b32.xlu1 %v3628_v18, %s3234_s29  ;;  %v1529_v18 = vld [vmem:[#allocation2 + $0xc] sm:$0x2]  ;;  %v2051_v61 = vld [vmem:[#allocation2 + $0x1a] sm:$0x3] }
 0x311   : > { %1555 = vst [vmem:[#allocation2 + $0x1c] sm:$0x2] %v1554_v17  ;;  %v2109_v2 = vsel %vm1597_vm12, %v2051_v61, 0 }
 0x313   : > { %v932_v0 = vpop.permute.xlu0 %931 }
 0x314   : > { %v1021_v22 = vsel %vm3683_vm9, %v932_v0, %v1020_v21  ;;  %1447 = vrot.lane.b32.xlu1 %v3631_v19, %s3234_s29  ;;  %v1532_v19 = vld [vmem:[#allocation2 + $0xe] sm:$0x2] }
 0x315   : > { %1022 = vst [vmem:[#allocation2 + $0x1e] sm:$0x1] %v1021_v22 }
 0x317   : > { %v1468_v47 = vpop.permute.xlu0 %1467 }
 0x318   : > { %v1557_v27 = vsel %vm3692_vm11, %v1468_v47, %v1556_v25  ;;  %913 = vrot.lane.b32.xlu1 %v3661_v35, %s3234_s29  ;;  %v2052_v3 = vld [vmem:[#allocation2 + $0x1c] sm:$0x3] }
 0x319   : > { %1558 = vst [vmem:[#allocation2 + $0x1e] sm:$0x2] %v1557_v27  ;;  %v2155_v26 = vsel %vm1597_vm12, %v2052_v3, 0 }
 0x31b   : > { %v1450_v28 = vpop.permute.xlu0 %1449 }
 0x31c   : > { %v1530_v54 = vsel %vm3692_vm11, %v1450_v28, %v1529_v18  ;;  %915 = vrot.lane.b32.xlu1 %v3672_v7, %s3234_s29  ;;  %v1577_v7 = vld [vmem:[#allocation2 + $0x2c] sm:$0x2] }
 0x31d   : > { %1531 = vst [vmem:[#allocation2 + $0xc] sm:$0x2] %v1530_v54 }
 0x31f   : > { %v1452_v40 = vpop.permute.xlu0 %1451 }
 0x320   : > { %v1533_v33 = vsel %vm3692_vm11, %v1452_v40, %v1532_v19  ;;  %v2053_v24 = vld [vmem:[#allocation2 + $0x1e] sm:$0x3] }
 0x321   : > { %1534 = vst [vmem:[#allocation2 + $0xe] sm:$0x2] %v1533_v33  ;;  %v2201_v11 = vsel %vm1597_vm12, %v2053_v24, 0 }
 0x323   : > { %v942_v55 = vpop.permute.xlu0 %941 }
 0x324   : > { %v1036_v35 = vsel %vm3683_vm9, %v942_v55, %v1035_v37 }
 0x325   : > { %1037 = vst [vmem:[#allocation2 + $0x28] sm:$0x1] %v1036_v35 }
 0x327   : > { %v1480_v6 = vpop.permute.xlu0 %1479 }
 0x328   : > { %v1575_v34 = vsel %vm3692_vm11, %v1480_v6, %v1574_v39 }
 0x329   : > { %1576 = vst [vmem:[#allocation2 + $0x2a] sm:$0x2] %v1575_v34 }
 0x32b   : > { %v1482_v63 = vpop.permute.xlu0 %1481 }
 0x32c   : > { %v1578_v49 = vsel %vm3692_vm11, %v1482_v63, %v1577_v7 }
 0x32d   : > { %1579 = vst [vmem:[#allocation2 + $0x2c] sm:$0x2] %v1578_v49 }
 0x388   : > { %v1798_v59 = vpop.xlane.xlu1 %1797 }
 0x389   : > { %3151 = vrcp.f32 %v1798_v59 }
 0x38c   : > { %v912_v14 = vpop.permute.xlu1 %911 }
 0x38d   : > { %v991_v62 = vsel %vm3683_vm9, %v912_v14, %v990_v60 }
 0x38e   : > { %992 = vst [vmem:[#allocation2 + $0xa] sm:$0x1] %v991_v62 }
 0x390   : > { %v1448_v32 = vpop.permute.xlu1 %1447 }
 0x391   : > { %v1527_v8 = vsel %vm3692_vm11, %v1448_v32, %v1526_v5 }
 0x392   : > { %1528 = vst [vmem:[#allocation2 + $0xa] sm:$0x2] %v1527_v8 }
 0x394   : > { %v914_v15 = vpop.permute.xlu1 %913 }
 0x395   : > { %v994_v53 = vsel %vm3683_vm9, %v914_v15, %v993_v44 }
 0x396   : > { %v3152_v23 = vpop.eup %3151  ;;  %995 = vst [vmem:[#allocation2 + $0xc] sm:$0x1] %v994_v53 }
 0x397   : > { %v1800_v42 = vmul.f32 %v3152_v23, %v3918_v30  ;;  %v2050_v30 = vld [vmem:[#allocation2 + $0x18] sm:$0x3] }
 0x398   : > { %v916_v45 = vpop.permute.xlu1 %915  ;;  %v2063_v52 = vsel %vm1597_vm12, %v2050_v30, 0 }
 0x399   : > { %v997_v43 = vsel %vm3683_vm9, %v916_v45, %v996_v41  ;;  %v1801_v56 = vpack.c.bf16 %v1800_v42, %v1800_v42  ;;  %v2046_v10 = vld [vmem:[#allocation2 + $0xa] sm:$0x3] }
 0x39a   : > { %998 = vst [vmem:[#allocation2 + $0xe] sm:$0x1] %v997_v43 }
 0x39b   : > { %3023 = vmatmul.mubr.msk.bf16.vlgmr.msra.gmra.mxu0 %vm1802_vm15, %v1801_v56  ;;  %3029 = vmatmul.mubr.msk.bf16.vlgmr.msra.gmra.mxu1 %vm1802_vm15, %v1801_v56 }
 0x39c   : > { %3033 = vmatpush3.bf16.msra.mxu0 %v1894_v57  ;;  %3039 = vmatpush3.bf16.msra.mxu1 %v1937_v58 }
 0x39d   : > { %3034 = vmatprep.mubr.msk.bf16.mxu0 %vm3236_vm7, %v3235_v9  ;;  %3040 = vmatprep.mubr.msk.bf16.mxu1 %vm3236_vm7, %v3235_v9  ;;  %v2047_v12 = vld [vmem:[#allocation2 + $0xc] sm:$0x3] }
 0x39e   : > { %3044 = vmatprep.subr.bf16.mxu0 %v3235_v9  ;;  %3050 = vmatprep.subr.bf16.mxu1 %v3235_v9 }
 0x3a1   : > { %v2048_v13 = vld [vmem:[#allocation2 + $0xe] sm:$0x3] }
 0x3a3   : > { %3035 = vmatmul.mubr.msk.bf16.vlgmr.msra.gmra.mxu0 %vm1802_vm15, %v1801_v56  ;;  %3041 = vmatmul.mubr.msk.bf16.vlgmr.msra.gmra.mxu1 %vm1802_vm15, %v1801_v56 }
 0x3a4   : > { %3045 = vmatpush3.bf16.xpose.msra.mxu0 %v2063_v52  ;;  %3051 = vmatpush3.bf16.xpose.msra.mxu1 %v2109_v2 }
 0x3a5   : > { %3046 = vmatprep.mubr.msk.bf16.mxu0 %vm3236_vm7, %v3235_v9  ;;  %3052 = vmatprep.mubr.msk.bf16.mxu1 %vm3236_vm7, %v3235_v9 }
 0x3a6   : > { %3056 = vmatprep.subr.bf16.mxu0 %v3235_v9  ;;  %3062 = vmatprep.subr.bf16.mxu1 %v3235_v9 }
 0x3ab   : > { %3047 = vmatmul.mubr.msk.bf16.vlgmr.msra.gmra.mxu0 %vm1597_vm12, %v2045_v48  ;;  %3053 = vmatmul.mubr.msk.bf16.vlgmr.msra.gmra.mxu1 %vm1597_vm12, %v2046_v10 }
 0x3ac   : > { %3057 = vmatpush3.bf16.xpose.msra.mxu0 %v2155_v26  ;;  %3063 = vmatpush3.bf16.xpose.msra.mxu1 %v2201_v11 }
 0x3ad   : > { %3058 = vmatprep.mubr.msk.bf16.mxu0 %vm3236_vm7, %v3235_v9  ;;  %3064 = vmatprep.mubr.msk.bf16.mxu1 %vm3236_vm7, %v3235_v9 }
 0x3ae   : > { %3068 = vmatprep.subr.bf16.mxu0 %v3235_v9  ;;  %3074 = vmatprep.subr.bf16.mxu1 %v3235_v9 }
 0x3b3   : > { %3059 = vmatmul.mubr.msk.bf16.vlgmr.msra.gmra.mxu0 %vm1597_vm12, %v2047_v12  ;;  %3065 = vmatmul.mubr.msk.bf16.vlgmr.msra.gmra.mxu1 %vm1597_vm12, %v2048_v13  ;;  %vm2531_vm12 = vcmask 64512  }
 0x3b4   : > { %3070 = vmatprep.mubr.msk.bf16.mxu0 %vm3236_vm7, %v3235_v9  ;;  %3076 = vmatprep.mubr.msk.bf16.mxu1 %vm3236_vm7, %v3235_v9 }
 0x45b   : > { %v1844_v16 = vpop.f32.mrf.mxu0  ;;  %v1887_v17 = vpop.f32.mrf.mxu1 }
 0x45c   : > { %v2955_v21 = vpack.c.bf16 %v1844_v16, %v1844_v16  ;;  %v2956_v0 = vpack.c.bf16 %v1887_v17, %v1887_v17 }
 0x45d   : > { %v3024_v22 = vpop.f32.mrf.mxu0  ;;  %v3030_v25 = vpop.f32.mrf.mxu1 }
 0x45e   : > { %v4001_v47 = vunpack.c.l.b16 %v2955_v21  ;;  %v4003_v27 = vunpack.c.l.b16 %v2956_v0 }
 0x45f   : > { %v1847_v18 = vpop.f32.mrf.mxu0  ;;  %v1890_v28 = vpop.f32.mrf.mxu1 }
 0x460   : > { %v2033_v54 = vrot.slane %v4001_v47, 3  ;;  %v2034_v19 = vrot.slane %v4003_v27, 2  ;;  %v2024_v39 = vrot.slane %v4001_v47, 2  ;;  %v2025_v6 = vrot.slane %v4003_v27, 1 }
 0x461   : > { %v3025_v40 = vpop.f32.mrf.mxu0  ;;  %v3031_v33 = vpop.f32.mrf.mxu1  ;;  %v1999_v63 = vrot.slane %v4003_v27, 7 }
 0x462   : > { %v2035_v35 = vsel %vm2000_vm1, %v2034_v19, %v2033_v54  ;;  %v2026_v44 = vsel %vm2000_vm1, %v2025_v6, %v2024_v39 }
 0x463   : > { %v1930_v37 = vpop.f32.mrf.mxu0  ;;  %v1973_v55 = vpop.f32.mrf.mxu1  ;;  %v2001_v42 = vsel %vm2000_vm1, %v1999_v63, %v4001_v47 }
 0x464   : > { %v2957_v34 = vpack.c.bf16 %v1930_v37, %v1930_v37  ;;  %v2958_v7 = vpack.c.bf16 %v1973_v55, %v1973_v55  ;;  %v2012_v55 = vrot.slane %v4001_v47, 1 }
 0x465   : > { %v3036_v49 = vpop.f32.mrf.mxu0  ;;  %v3042_v59 = vpop.f32.mrf.mxu1 }
 0x466   : > { %v1997_v60 = vunpack.c.l.b16 %v2957_v34  ;;  %v1998_v14 = vunpack.c.l.b16 %v2958_v7  ;;  %v2013_v39 = vsel %vm2000_vm1, %v4003_v27, %v2012_v55  ;;  %v1571_v49 = vld [vmem:[#allocation2 + $0x28] sm:$0x2] }
 0x467   : > { %v1933_v62 = vpop.f32.mrf.mxu0  ;;  %v1976_v5 = vpop.f32.mrf.mxu1 }
 0x468   : > { %v2002_v32 = vrot.slane %v1997_v60, 6  ;;  %v2036_v8 = vrot.slane %v1997_v60, 1  ;;  %v2005_v15 = vrot.slane %v1998_v14, 5  ;;  %v2028_v53 = vrot.slane %v1998_v14, 7 }
 0x469   : > { %v3037_v23 = vpop.f32.mrf.mxu0  ;;  %v3043_v41 = vpop.f32.mrf.mxu1  ;;  %v2027_v45 = vsel %vm2003_vm2, %v1997_v60, %v2026_v44  ;;  %v2016_v6 = vrot.slane %v1998_v14, 6 }
 0x46a   : > { %v2004_v38 = vsel %vm2003_vm2, %v2002_v32, %v2001_v42  ;;  %v2037_v46 = vsel %vm2003_vm2, %v2036_v8, %v2035_v35  ;;  %v2029_v30 = vsel %vm2006_vm3, %v2028_v53, %v2027_v45  ;;  %v2014_v35 = vrot.slane %v1997_v60, 7 }
 0x46b   : > { %v2099_v43 = vpop.f32.mrf.mxu0  ;;  %v2145_v56 = vpop.f32.mrf.mxu1  ;;  %v2007_v57 = vsel %vm2006_vm3, %v2005_v15, %v2004_v38  ;;  %v4019_v58 = vsel %vm2006_vm3, %v1998_v14, %v2037_v46  ;;  %v2030_v3 = vpack.c.b16 %v2029_v30, %v2029_v30  ;;  %v1044_v15 = vld [vmem:[#allocation2 + $0x2e] sm:$0x1] }
 0x46c   : > { %v2008_v61 = vpack.c.b16 %v2007_v57, %v2007_v57  ;;  %v2243_v10 = vsel %vm1782_vm13, %v2099_v43, 0.0  ;;  %v2244_v26 = vsel %vm1782_vm13, %v2145_v56, 0.0  ;;  %v2015_v34 = vsel %vm2003_vm2, %v2014_v35, %v2013_v39  ;;  %v1580_v43 = vld [vmem:[#allocation2 + $0x2e] sm:$0x2] }
 0x46d   : > { %v3048_v52 = vpop.f32.mrf.mxu0  ;;  %v3054_v2 = vpop.f32.mrf.mxu1  ;;  %2032 = vst.msk [vmem:[#allocation3 + $0x4] sm:$0x3] %vm2010_vm4, %v2030_v3  ;;  %v2245_v13 = vadd.f32 %v2244_v26, %v2243_v10  ;;  %v2017_v7 = vsel %vm2006_vm3, %v2016_v6, %v2015_v34  ;;  %v2039_v51 = vpack.c.b16 %v4019_v58, %v4019_v58 }
 0x46e   : > { %2011 = vst.msk [vmem:[#allocation3] sm:$0x3] %vm2010_vm4, %v2008_v61 }
 0x46f   : > { %v2102_v24 = vpop.f32.mrf.mxu0  ;;  %v2148_v48 = vpop.f32.mrf.mxu1 }
 0x471   : > { %v3049_v11 = vpop.f32.mrf.mxu0  ;;  %v3055_v12 = vpop.f32.mrf.mxu1 }
 0x473   : > { %v2191_v16 = vpop.f32.mrf.mxu0  ;;  %v2237_v17 = vpop.f32.mrf.mxu1 }
 0x474   : > { %v2246_v21 = vsel %vm1782_vm13, %v2191_v16, 0.0  ;;  %v2248_v18 = vsel %vm1782_vm13, %v2237_v17, 0.0 }
 0x475   : > { %v2247_v0 = vadd.f32 %v2246_v21, %v2245_v13  ;;  %v3060_v22 = vpop.f32.mrf.mxu0  ;;  %v3066_v25 = vpop.f32.mrf.mxu1 }
 0x477   : > { %v2249_v28 = vadd.f32 %v2248_v18, %v2247_v0  ;;  %v2194_v54 = vpop.f32.mrf.mxu0  ;;  %v2240_v19 = vpop.f32.mrf.mxu1 }
 0x479   : > { %v3061_v40 = vpop.f32.mrf.mxu0  ;;  %v3067_v33 = vpop.f32.mrf.mxu1  ;;  %v2250_v37 = vsel %vm1782_vm13, %v2249_v28, -inf }
 0x47a   : > { %2251 = vmax.xlane.f32.xlu1 %v2250_v37 }
 0x48b   : > { %1477 = vrot.lane.b32.xlu1 %v3828_v50, %s3234_s29  ;;  %v2018_v50 = vpack.c.b16 %v2017_v7, %v2017_v7 }
 0x48f   : > { %943 = vrot.lane.b32.xlu1 %v3834_v36, %s3234_s29 }
 0x493   : > { %945 = vrot.lane.b32.xlu1 %v3837_v31, %s3234_s29  ;;  %v1038_v31 = vld [vmem:[#allocation2 + $0x2a] sm:$0x1] }
 0x497   : > { %947 = vrot.lane.b32.xlu1 %v3849_v29, %s3234_s29  ;;  %v1041_v29 = vld [vmem:[#allocation2 + $0x2c] sm:$0x1] }
 0x49b   : > { %2019 = vrot.lane.b32.xlu1 %v2018_v50, %s3234_s29 }
 0x503   : > { %v2252_v47 = vpop.xlane.xlu1 %2251 }
 0x504   : > { %v2253_v63 = vsub.f32 %v2249_v28, %v2252_v47 }
 0x506   : > { %v2254_v36 = vmul.f32 1.442695, %v2253_v63 }
 0x507   : > { %v1478_v59 = vpop.permute.xlu1 %1477 }
 0x508   : > { %3153 = vpow2.f32 %v2254_v36  ;;  %v1572_v27 = vsel %vm3692_vm11, %v1478_v59, %v1571_v49 }
 0x509   : > { %1573 = vst [vmem:[#allocation2 + $0x28] sm:$0x2] %v1572_v27 }
 0x50b   : > { %v944_v60 = vpop.permute.xlu1 %943 }
 0x50c   : > { %v1039_v14 = vsel %vm3683_vm9, %v944_v60, %v1038_v31 }
 0x50d   : > { %1040 = vst [vmem:[#allocation2 + $0x2a] sm:$0x1] %v1039_v14 }
 0x50f   : > { %v946_v62 = vpop.permute.xlu1 %945 }
 0x510   : > { %v1042_v5 = vsel %vm3683_vm9, %v946_v62, %v1041_v29  ;;  %v2055_v32 = vld [vmem:[#allocation2 + $0x28] sm:$0x3] }
 0x511   : > { %1043 = vst [vmem:[#allocation2 + $0x2c] sm:$0x1] %v1042_v5  ;;  %v2266_v8 = vsel %vm1806_vm14, %v2055_v32, 0 }
 0x512   : > { %3069 = vmatpush3.bf16.msra.mxu0 %v2266_v8 }
 0x513   : > { %v948_v44 = vpop.permute.xlu1 %947  ;;  %3080 = vmatprep.subr.bf16.mxu0 %v3235_v9 }
 0x514   : > { %v1045_v53 = vsel %vm3683_vm9, %v948_v44, %v1044_v15  ;;  %v2056_v23 = vld [vmem:[#allocation2 + $0x2a] sm:$0x3]  ;;  %vm2469_vm9 = vcmask 519170  }
 0x515   : > { %v3154_v41 = vpop.eup %3153  ;;  %1046 = vst [vmem:[#allocation2 + $0x2e] sm:$0x1] %v1045_v53  ;;  %v2309_v42 = vsel %vm1806_vm14, %v2056_v23, 0 }
 0x516   : > { %3075 = vmatpush3.bf16.msra.mxu1 %v2309_v42  ;;  %v2256_v45 = vsel %vm1782_vm13, %v3154_v41, 0.0 }
 0x517   : > { %2257 = vadd.xlane.f32.xlu0 %v2256_v45  ;;  %v2020_v38 = vpop.permute.xlu1 %2019  ;;  %3086 = vmatprep.subr.bf16.mxu1 %v3235_v9 }
 0x518   : > { %2023 = vst.msk [vmem:[#allocation3] sm:$0x3] %vm2022_vm5, %v2020_v38  ;;  %v2057_v2 = vld [vmem:[#allocation2 + $0x2c] sm:$0x3] }
 0x519   : > { %v2352_v58 = vsel %vm1806_vm14, %v2057_v2, 0  ;;  %v2594_v2 = vld [vmem:[%s4192_s6 + $0x8] sm:$0xff] }
 0x52d   : > { %1483 = vrot.lane.b32.xlu0 %v3843_v20, %s3234_s29 }
 0x531   : > { %2040 = vrot.lane.b32.xlu0 %v2039_v51, %s3234_s29 }
 0x5a0   : > { %v2258_v46 = vpop.xlane.xlu0 %2257 }
 0x5a1   : > { %3155 = vrcp.f32 %v2258_v46 }
 0x5a4   : > { %v1484_v56 = vpop.permute.xlu0 %1483 }
 0x5a5   : > { %v1581_v57 = vsel %vm3692_vm11, %v1484_v56, %v1580_v43  ;;  %vm2535_vm11 = vcmask 1043456  }
 0x5a6   : > { %1582 = vst [vmem:[#allocation2 + $0x2e] sm:$0x2] %v1581_v57 }
 0x5a8   : > { %v2041_v30 = vpop.permute.xlu0 %2040 }
 0x5a9   : > { %2043 = vst.msk [vmem:[#allocation3 + $0x4] sm:$0x3] %vm2022_vm5, %v2041_v30 }
 0x5ad   : > { %v2058_v20 = vld [vmem:[#allocation2 + $0x2e] sm:$0x3] }
 0x5ae   : > { %v3156_v61 = vpop.eup %3155  ;;  %v2395_v24 = vsel %vm1806_vm14, %v2058_v20, 0  ;;  %v2593_v20 = vld [vmem:[%s4192_s6] sm:$0xff] }
 0x5af   : > { %v2260_v52 = vmul.f32 %v3156_v61, %v3154_v41  ;;  %v2510_v61 = vld [vmem:[%s4190_s4 + $0x8] sm:$0xff] }
 0x5b1   : > { %v2261_v3 = vpack.c.bf16 %v2260_v52, %v2260_v52  ;;  %v2509_v52 = vld [vmem:[%s4190_s4] sm:$0xff] }
 0x5b3   : > { %3071 = vmatmul.mubr.msk.bf16.vlgmr.msra.gmra.mxu0 %vm1802_vm15, %v2261_v3  ;;  %3077 = vmatmul.mubr.msk.bf16.vlgmr.msra.gmra.mxu1 %vm1802_vm15, %v2261_v3 }
 0x5b4   : > { %3081 = vmatpush3.bf16.msra.mxu0 %v2352_v58  ;;  %3087 = vmatpush3.bf16.msra.mxu1 %v2395_v24  ;;  %v2696_v58 = vld [vmem:[%s4194_s8] sm:$0xff]  ;;  %v2760_v24 = vld [vmem:[%s4195_s9 + $0x8] sm:$0xff] }
 0x5b5   : > { %3082 = vmatprep.mubr.msk.bf16.mxu0 %vm3236_vm7, %v3235_v9  ;;  %3088 = vmatprep.mubr.msk.bf16.mxu1 %vm3236_vm7, %v3235_v9  ;;  %vm2462_vm7 = vcmask 1046534  }
 0x5bb   : > { %3083 = vmatmul.mubr.msk.bf16.vlgmr.msra.gmra.mxu0 %vm1802_vm15, %v2261_v3  ;;  %3089 = vmatmul.mubr.msk.bf16.vlgmr.msra.gmra.mxu1 %vm1802_vm15, %v2261_v3  ;;  %v2697_v3 = vld [vmem:[%s4194_s8 + $0x8] sm:$0xff] }
 0x5bc   : > { %2574 = vmatprep.mubr.bf16.mxu0 %v3231_v4  ;;  %2645 = vmatprep.mubr.bf16.mxu1 %v3231_v4 }
 0x673   : > { %v2302_v1 = vpop.f32.mrf.mxu0  ;;  %v2345_v48 = vpop.f32.mrf.mxu1 }
 0x674   : > { %v2959_v10 = vpack.c.bf16 %v2302_v1, %v2302_v1  ;;  %v2960_v26 = vpack.c.bf16 %v2345_v48, %v2345_v48  ;;  %v2759_v1 = vld [vmem:[%s4195_s9] sm:$0xff]  ;;  %v2776_v48 = vld [vmem:[%s4196_s10 + $0x8] sm:$0xff] }
 0x675   : > { %v3072_v11 = vpop.f32.mrf.mxu0  ;;  %v3078_v12 = vpop.f32.mrf.mxu1 }
 0x676   : > { %v2453_v13 = vunpack.c.l.b16 %v2959_v10  ;;  %v2454_v16 = vunpack.c.l.b16 %v2960_v26  ;;  %v2775_v10 = vld [vmem:[%s4196_s10] sm:$0xff] }
 0x677   : > { %v2305_v17 = vpop.f32.mrf.mxu0  ;;  %v2348_v21 = vpop.f32.mrf.mxu1 }
 0x678   : > { %v2457_v22 = vrot.slane %v2453_v13, 4  ;;  %v2471_v25 = vrot.slane %v2453_v13, 5  ;;  %v2484_v18 = vrot.slane %v2453_v13, 6  ;;  %v2494_v28 = vrot.slane %v2453_v13, 7  ;;  %v3146_v21 = vld [vmem:[%s4189_s3] sm:$0xff]  }
 0x679   : > { %v3073_v0 = vpop.f32.mrf.mxu0  ;;  %v3079_v9 = vpop.f32.mrf.mxu1  ;;  %v2458_v54 = vrot.slane %v2454_v16, 3  ;;  %v2472_v19 = vrot.slane %v2454_v16, 4  ;;  %v2485_v40 = vrot.slane %v2454_v16, 5  ;;  %v2495_v33 = vrot.slane %v2454_v16, 6 }
 0x67b   : > { %v2388_v37 = vpop.f32.mrf.mxu0  ;;  %v2431_v55 = vpop.f32.mrf.mxu1  ;;  %v2496_v36 = vsel %vm2459_vm6, %v2495_v33, %v2494_v28  ;;  %v2473_v49 = vsel %vm2459_vm6, %v2472_v19, %v2471_v25  ;;  %v2486_v59 = vsel %vm2459_vm6, %v2485_v40, %v2484_v18  ;;  %v2460_v27 = vsel %vm2459_vm6, %v2458_v54, %v2457_v22 }
 0x67c   : > { %v2961_v35 = vpack.c.bf16 %v2388_v37, %v2388_v37  ;;  %v2962_v39 = vpack.c.bf16 %v2431_v55, %v2431_v55  ;;  %v3165_v37 = vld [vmem:[%s3372_s13 + $0x10] sm:$0xff] }
 0x67d   : > { %v3084_v6 = vpop.f32.mrf.mxu0  ;;  %v3090_v34 = vpop.f32.mrf.mxu1 }
 0x67e   : > { %v2455_v7 = vunpack.c.l.b16 %v2961_v35  ;;  %v2456_v50 = vunpack.c.l.b16 %v2962_v39  ;;  %v3166_v35 = vld [vmem:[%s3372_s13 + $0x8] sm:$0xff]  ;;  %v3167_v6 = vld [vmem:[%s3372_s13 + $0x18] sm:$0xff] }
 0x67f   : > { %v2391_v47 = vpop.f32.mrf.mxu0  ;;  %v2434_v63 = vpop.f32.mrf.mxu1 }
 0x680   : > { %v2461_v31 = vrot.slane %v2455_v7, 2  ;;  %v2474_v60 = vrot.slane %v2455_v7, 3  ;;  %v2487_v14 = vrot.slane %v2455_v7, 4  ;;  %v2497_v29 = vrot.slane %v2455_v7, 5  ;;  %v3168_v7 = vld [vmem:[%s3372_s13] sm:$0xff]  ;;  %v3147_v63 = vld [vmem:[%s4191_s5] sm:$0xff]  }
 0x681   : > { %v2464_v62 = vrot.slane %v2456_v50, 1  ;;  %v2489_v5 = vrot.slane %v2456_v50, 3  ;;  %v3085_v32 = vpop.f32.mrf.mxu0  ;;  %v3091_v8 = vpop.f32.mrf.mxu1  ;;  %v2499_v15 = vrot.slane %v2456_v50, 4  ;;  %v2476_v44 = vrot.slane %v2456_v50, 2  ;;  %s3237_s13 = smov [#allocation5]  }
 0x682   : > { %v2498_v53 = vsel %vm2462_vm7, %v2497_v29, %v2496_v36  ;;  %v2475_v23 = vsel %vm2462_vm7, %v2474_v60, %v2473_v49  ;;  %v2488_v41 = vsel %vm2462_vm7, %v2487_v14, %v2486_v59  ;;  %v2463_v42 = vsel %vm2462_vm7, %v2461_v31, %v2460_v27  ;;  %s3173_s30 = sshll.u32 %s3237_s13, 4  ;;  %s3174_s30 = int_to_ptr.vmem [resolvable:$false] %s3173_s30 }
 0x683   : > { %v2500_v45 = vsel %vm2465_vm8, %v2499_v15, %v2498_v53  ;;  %v2477_v38 = vsel %vm2465_vm8, %v2476_v44, %v2475_v23  ;;  %v2490_v51 = vsel %vm2465_vm8, %v2489_v5, %v2488_v41  ;;  %v2466_v46 = vsel %vm2465_vm8, %v2464_v62, %v2463_v42  ;;  %p3176_p2 = scmp.lt.s32.totalorder %s4136_s22, %s3174_s30 }
 0x684   : > { %v2501_v43 = vpack.c.b16 %v2500_v45, %v2500_v45  ;;  %v2478_v56 = vpack.c.b16 %v2477_v38, %v2477_v38  ;;  %v2491_v57 = vpack.c.b16 %v2490_v51, %v2490_v51  ;;  %v2467_v30 = vpack.c.b16 %v2466_v46, %v2466_v46 }
 0x686   : > { %2502 = vrot.lane.b32.xlu0 %v2501_v43, %s3234_s29  ;;  %2479 = vrot.lane.b32.xlu1 %v2478_v56, %s3234_s29  ;;  %2493 = vst.msk [vmem:[#allocation3 + $0x4] sm:$0xc] %vm2469_vm9, %v2491_v57  ;;  %2470 = vst.msk [vmem:[#allocation3] sm:$0xc] %vm2469_vm9, %v2467_v30  ;;  %s4212_s29 = sadd.s32 4294967295, %s3229_s20  }
 0x687   : > { %s2963_s0 = sshll.u32 %s4212_s29, 8  ;;  %s3175_s29 = scalar_lea.vmem %s3174_s30, 1024 }
 0x688   : > { %s4141_s14 = scalar_lea.hbm %s4197_s11, %s2963_s0  ;;  %p3177_p3 = scmp.lt.s32.totalorder %s3175_s29, %s3169_s25 }
 0x68a   : > { %2518 = vperm.xlu0 %3140, %v2510_v61   ;;  %2513 = vperm.xlu1 %3141, %v2509_v52   ;;  %p3178_p4 = por %p3177_p3, %p3176_p2 }
 0x68c   : > { %p3179_p5 = pnand %p3178_p4, %p3172_p1 }
 0x68e   : > { %2602 = vperm.xlu0 %3140, %v2594_v2   ;;  %2597 = vperm.xlu1 %3141, %v2593_v20  }
 0x692   : > { %2705 = vperm.xlu0 %3140, %v2697_v3   ;;  %2700 = vperm.xlu1 %3141, %v2696_v58  }
 0x696   : > { %2768 = vperm.xlu0 %3140, %v2760_v24   ;;  %2763 = vperm.xlu1 %3141, %v2759_v1  }
 0x69a   : > { %2784 = vperm.xlu0 %3140, %v2776_v48   ;;  %2779 = vperm.xlu1 %3141, %v2775_v10  }
 0x6f8   : > { %v2503_v26 = vpop.permute.xlu0 %2502  ;;  %v2480_v11 = vpop.permute.xlu1 %2479 }
 0x6f9   : > { %2505 = vst.msk [vmem:[#allocation3 + $0x4] sm:$0xc] %vm2482_vm10, %v2503_v26  ;;  %2483 = vst.msk [vmem:[#allocation3] sm:$0xc] %vm2482_vm10, %v2480_v11 }
 0x700   : > { %v2506_v12 = vld [vmem:[#allocation3] sm:$0xff] }
 0x701   : > { %v2942_v13 = vcombine.high %v2506_v12, %v2506_v12  ;;  %v2941_v16 = vcombine.low %v2506_v12, %v2506_v12 }
 0x703   : > { %2943 = vmatprep.subr.msk.bf16.mxu0 %vm2535_vm11, %v2942_v13  ;;  %v2537_v17 = vsel %vm2535_vm11, %v2941_v16, 0 }
 0x704   : > { %2557 = vmatpush1.bf16.msra.mxu0 %v2537_v17 }
 0x705   : > { %v2519_v22 = vpop.permute.xlu0 %2518  ;;  %v2514_v25 = vpop.permute.xlu1 %2513 }
 0x707   : > { %2944 = vmatmul.mubr.msk.bf16.vlgmr.msra.gmra.mxu0 %vm2531_vm12, %v3146_v21 }
 0x708   : > { %2748 = vmatprep.mubr.bf16.mxu0 %v3231_v4 }
 0x709   : > { %v2598_v36 = vpop.permute.xlu1 %2597  ;;  %v2603_v14 = vpop.permute.xlu0 %2602 }
 0x7c7   : > { %v2576_v0 = vpop.f32.mrf.mxu0 }
 0x7c8   : > { %v2577_v19 = vadd.f32 %v2576_v0, %v2514_v25 }
 0x7c9   : > { %v2578_v9 = vpop.f32.mrf.mxu0 }
 0x7ca   : > { %v2579_v28 = vadd.f32 %v2578_v9, %v2514_v25  ;;  %v2585_v50 = vadd.f32 %v3168_v7, %v2577_v19  ;;  %v2706_v19 = vpop.permute.xlu0 %2705 }
 0x7cb   : > { %v2580_v18 = vpop.f32.mrf.mxu0 }
 0x7cc   : > { %v2581_v54 = vadd.f32 %v2580_v18, %v2519_v22  ;;  %v2586_v39 = vadd.f32 %v3166_v35, %v2579_v28  ;;  %v3148_v28 = vld [vmem:[%s4193_s7] sm:$0xff]  }
 0x7cd   : > { %v2582_v40 = vpop.f32.mrf.mxu0 }
 0x7ce   : > { %v2583_v33 = vadd.f32 %v2582_v40, %v2519_v22  ;;  %v2587_v55 = vadd.f32 %v3165_v37, %v2581_v54  ;;  %v2701_v54 = vpop.permute.xlu1 %2700 }
 0x7d0   : > { %v2588_v34 = vadd.f32 %v3167_v6, %v2583_v33  ;;  %v2591_v47 = vpack.c.bf16 %v2587_v55, %v2585_v50  ;;  %v2769_v55 = vpop.permute.xlu0 %2768 }
 0x7d2   : > { %v2592_v4 = vpack.c.bf16 %v2588_v34, %v2586_v39  ;;  %v2764_v40 = vpop.permute.xlu1 %2763 }
 0x7d4   : > { %2627 = vmatprep.subr.bf16.mxu1 %v2592_v4 }
 0x7d5   : > { %2628 = vmatpush1.bf16.msra.mxu1 %v2591_v47 }
 0x7d6   : > { %v2780_v34 = vpop.permute.xlu1 %2779 }
 0x7d8   : > { %2946 = vmatmul.mubr.msk.bf16.vlgmr.msra.gmra.mxu1 %vm449_vm0, %v3147_v63 }
 0x898   : > { %v2647_v49 = vpop.f32.mrf.mxu1 }
 0x899   : > { %v2648_v59 = vadd.f32 %v2647_v49, %v2598_v36 }
 0x89a   : > { %v2649_v27 = vpop.f32.mrf.mxu1 }
 0x89b   : > { %v2660_v31 = vmul.f32 0.044715, %v2648_v59  ;;  %v2650_v60 = vadd.f32 %v2649_v27, %v2598_v36  ;;  %v2656_v17 = vmul.f32 0.5, %v2648_v59  ;;  %v2785_v27 = vpop.permute.xlu0 %2784 }
 0x89c   : > { %v2651_v29 = vpop.f32.mrf.mxu1 }
 0x89d   : > { %v2664_v62 = vmul.f32 %v2660_v31, %v2648_v59  ;;  %v2661_v5 = vmul.f32 0.044715, %v2650_v60  ;;  %v2652_v32 = vadd.f32 %v2651_v29, %v2603_v14  ;;  %v2657_v12 = vmul.f32 0.5, %v2650_v60 }
 0x89e   : > { %v2653_v8 = vpop.f32.mrf.mxu1 }
 0x89f   : > { %v2668_v15 = vmul.f32 %v2664_v62, %v2648_v59  ;;  %v2665_v44 = vmul.f32 %v2661_v5, %v2650_v60  ;;  %v2662_v53 = vmul.f32 0.044715, %v2652_v32  ;;  %v2654_v23 = vadd.f32 %v2653_v8, %v2603_v14 }
 0x8a0   : > { %v2658_v26 = vmul.f32 0.5, %v2652_v32 }
 0x8a1   : > { %v2672_v41 = vadd.f32 %v2668_v15, %v2648_v59  ;;  %v2669_v42 = vmul.f32 %v2665_v44, %v2650_v60  ;;  %v2666_v45 = vmul.f32 %v2662_v53, %v2652_v32  ;;  %v2663_v38 = vmul.f32 0.044715, %v2654_v23 }
 0x8a2   : > { %v2659_v13 = vmul.f32 0.5, %v2654_v23 }
 0x8a3   : > { %v2670_v51 = vmul.f32 %v2666_v45, %v2652_v32  ;;  %v2667_v46 = vmul.f32 %v2663_v38, %v2654_v23  ;;  %v2673_v43 = vadd.f32 %v2669_v42, %v2650_v60  ;;  %v2676_v56 = vmul.f32 0.7978846, %v2672_v41 }
 0x8a5   : > { %v2674_v57 = vadd.f32 %v2670_v51, %v2652_v32  ;;  %v2671_v30 = vmul.f32 %v2667_v46, %v2654_v23  ;;  %v2677_v61 = vmul.f32 0.7978846, %v2673_v43 }
 0x8a7   : > { %v2678_v52 = vmul.f32 0.7978846, %v2674_v57  ;;  %v2675_v2 = vadd.f32 %v2671_v30, %v2654_v23  ;;  %3157 = vtanh.f32 %v2677_v61 }
 0x8a8   : > { %3159 = vtanh.f32 %v2676_v56 }
 0x8a9   : > { %3161 = vtanh.f32 %v2678_v52  ;;  %v2679_v20 = vmul.f32 0.7978846, %v2675_v2 }
 0x8ab   : > { %3163 = vtanh.f32 %v2679_v20 }
 0x8b4   : > { %v3158_v3 = vpop.eup %3157 }
 0x8b5   : > { %v3160_v58 = vpop.eup %3159  ;;  %v2685_v1 = vadd.f32 1.0, %v3158_v3 }
 0x8b6   : > { %v3162_v24 = vpop.eup %3161  ;;  %v2684_v11 = vadd.f32 1.0, %v3160_v58 }
 0x8b7   : > { %v2686_v48 = vadd.f32 1.0, %v3162_v24  ;;  %v2689_v0 = vmul.f32 %v2685_v1, %v2657_v12 }
 0x8b8   : > { %v3164_v10 = vpop.eup %3163  ;;  %v2688_v22 = vmul.f32 %v2684_v11, %v2656_v17 }
 0x8b9   : > { %v2687_v16 = vadd.f32 1.0, %v3164_v10  ;;  %v2690_v21 = vmul.f32 %v2686_v48, %v2658_v26 }
 0x8bb   : > { %v2691_v9 = vmul.f32 %v2687_v16, %v2659_v13  ;;  %v2694_v18 = vpack.c.bf16 %v2690_v21, %v2688_v22 }
 0x8bd   : > { %v2695_v25 = vpack.c.bf16 %v2691_v9, %v2689_v0 }
 0x8bf   : > { %2730 = vmatprep.subr.bf16.mxu0 %v2695_v25 }
 0x8c0   : > { %2731 = vmatpush1.bf16.msra.mxu0 %v2694_v18 }
 0x8c3   : > { %2948 = vmatmul.mubr.msk.bf16.vlgmr.msra.gmra.mxu0 %vm449_vm0, %v3148_v28 }
 0x983   : > { %v2750_v33 = vpop.f32.mrf.mxu0 }
 0x984   : > { %v2751_v37 = vadd.f32 %v2750_v33, %v2701_v54 }
 0x985   : > { %v2752_v35 = vpop.f32.mrf.mxu0 }
 0x986   : > { %v2771_v39 = vmul.f32 %v2764_v40, %v2751_v37  ;;  %v2753_v6 = vadd.f32 %v2752_v35, %v2701_v54 }
 0x987   : > { %v2754_v7 = vpop.f32.mrf.mxu0 }
 0x988   : > { %v2787_v50 = vadd.f32 %v2780_v34, %v2771_v39  ;;  %v2772_v4 = vmul.f32 %v2764_v40, %v2753_v6  ;;  %v2755_v47 = vadd.f32 %v2754_v7, %v2706_v19 }
 0x989   : > { %v2756_v63 = vpop.f32.mrf.mxu0 }
 0x98a   : > { %2791 = vst [vmem:[%s410_s12] sm:$0xff] %v2787_v50  ;;  %v2788_v36 = vadd.f32 %v2780_v34, %v2772_v4  ;;  %v2773_v49 = vmul.f32 %v2769_v55, %v2755_v47  ;;  %v2757_v59 = vadd.f32 %v2756_v63, %v2706_v19 }
 0x98c   : > { %2792 = vst [vmem:[%s410_s12 + $0x8] sm:$0xff] %v2788_v36  ;;  %v2789_v31 = vadd.f32 %v2785_v27, %v2773_v49  ;;  %v2774_v60 = vmul.f32 %v2769_v55, %v2757_v59 }
 0x98e   : > { %2793 = vst [vmem:[%s410_s12 + $0x10] sm:$0xff] %v2789_v31  ;;  %v2790_v14 = vadd.f32 %v2785_v27, %v2774_v60 }
 0x990   : > { %2794 = vst [vmem:[%s410_s12 + $0x18] sm:$0xff] %v2790_v14 }
 0x991   : > { %3182 = shalt.err (!%p3179_p5)
}
 0x992   : > { %s3183_s12 = scalar_lea.hbm %s4141_s14, 512  ;;  %s3187_s21 = scalar_lea.hbm %s4197_s11, 1024 }
 0x993   : > { %p3184_p7 = scmp.ne.s32.totalorder %s4141_s14, %s3183_s12  ;;  %p3188_p12 = scmp.lt.s32.totalorder %s4141_s14, %s4197_s11 }
 0x994   : > { %p3189_p13 = scmp.lt.s32.totalorder %s3187_s21, %s3183_s12 }
 0x995   : > { %p3185_p10 = pnand %p3184_p7, %p3339_p6 }
 0x996   : > { %p3190_p0 = por %p3189_p13, %p3188_p12 }
 0x997   : > { %p3186_p11 = pneg %p3185_p10 }
 0x999   : > { %p3191_p1 = pnand %p3190_p0, %p3186_p11 }
 0x99b   : > { %3194 = shalt.err (!%p3191_p1)
}
 0x99c   : > { %s3238_s25 = smov 256   ;;  %s3239_s30 = smov 512  }
 0x99d   : > { %s3240_s29 = smov 16  }
 0x99e   : > { %3092 = dma.vmem_to_hbm [thread:$0]  (%p3339_p6), %s4136_s22, 512, %s4141_s14, %s4145_s16, %s3238_s25, %s3239_s30, %s3240_s29  }
 0x99f PF: > { %s2824_s0 = sand.u32 1, %s3217_s17   ;;  %p3095_p2 = pnand %p2879_p9, %p3343_p8 }
 0x9a0   : > { %s2825_s12 = scalar_lea.sflag [#allocation6], %s2824_s0 }
 0x9a1   : > { %p3096_p3 = pneg %p3095_p2 }
 0x9a3   : > { %3212 = dma.done.wait (%p3096_p3), %s2825_s12, 512  }
 0x9a4   : > { %3214 = vsyncadd (%p3096_p3), %s2825_s12, 4294966784  ;;  %p21_p4 = scmp.ge.s32.totalorder %s3324_s23, 4   ;;  %s4214_s17 = smov %s3221_s18 }
 0x9a5   : > { %s4215_s18 = smov %s3225_s19  ;;  %s4216_s19 = smov %s3337_s26 }
 0x9a6   : > { %s4217_s20 = smov %s3324_s23  ;;  %23 = sbr.rel (!%p21_p4) target bundleno = 5 (0x5), region = 132 }
 0x9ab   :  { %2830 = vsyncpa [#allocation6], 1 }
 0x9ac   :  { %2832 = vsyncpa [#allocation6 + $0x1], 1 }

</bundles_post_ra>
